<compile_context>
chip_gen: v7x
topology: tpu7x:2x2x1
jax: 0.10.0
libtpu: 0.0.40
codegen_flags: <defaults>
</compile_context>

<pallas_src>
import jax
import jax.numpy as jnp
from jax import lax
from jax.experimental import pallas as pl
from jax.experimental.pallas import tpu as pltpu

# ---------------- model hyper-parameters (small, synthetic) ----------------
HD = 32                 # hidden_dim
DIM_DIV = 2
INTD = HD // DIM_DIV    # per-category embedding dim
HD2 = HD // 2
N_LAYERS = 2
LN_EPS = 1e-5

N_TEST = 20
N_QUESTION = 30
N_TAG = 10
CONT_PAD = 8            # single cont feature ("elapsed") zero-padded to 8 cols
                        # so the MXU contraction dim is not degenerate;
                        # padded cols are exactly zero -> math identical to Linear(1, hd/2)

B, S = 2, 8
FEAT = 4 * INTD + CONT_PAD   # fused projection input width (64 + 8 = 72)


# ---------------------------- fused Pallas kernel ---------------------------
def _dkt_fused_kernel(feat_ref, wp_ref, wbig_ref, small_ref, out_ref):
    """Fused (comb|cont) projection + LayerNorm + interleaved 2-layer LSTM.

    feat_ref  : [S*B, FEAT]  token features, rows ordered (s, b)
    wp_ref    : [FEAT, HD]   block-diagonal fused projection weight
    wbig_ref  : [4*HD, 4*HD] stacked LSTM weights, rows =
                [W_ih(l0); W_hh(l0); W_ih(l1); W_hh(l1)]  (gate order i,f,o,g)
    small_ref : [3, 4*HD]    row0 = b_ih0+b_hh0, row1 = b_ih1+b_hh1,
                             row2 = [proj bias | LN gamma | LN beta | pad]
    out_ref   : [S*B, HD]    layer-2 hidden states, rows ordered (s, b)
    """
    f32 = jnp.float32

    # ---- unpack small packed params (static slices of a tiny VMEM ref) ----
    bias0 = small_ref[0:1, :]                 # [1, 4H]
    bias1 = small_ref[1:2, :]                 # [1, 4H]
    bp    = small_ref[2:3, 0:HD]              # [1, H]  fused proj bias
    gp    = small_ref[2:3, HD:2 * HD]         # [1, H]  LN gamma (comb|cont)
    betap = small_ref[2:3, 2 * HD:3 * HD]     # [1, H]  LN beta  (comb|cont)

    # ---- fused comb/cont projection: one MXU push + per-half LayerNorm ----
    y = jnp.dot(feat_ref[...], wp_ref[...],
                preferred_element_type=f32) + bp                 # [S*B, HD]

    def _norm(v):
        mu = jnp.mean(v, axis=-1, keepdims=True)
        var = jnp.mean(jnp.square(v - mu), axis=-1, keepdims=True)
        return (v - mu) * lax.rsqrt(var + LN_EPS)

    x_cate = _norm(y[:, 0:HD2]) * gp[:, 0:HD2] + betap[:, 0:HD2]
    x_cont = _norm(y[:, HD2:HD]) * gp[:, HD2:HD] + betap[:, HD2:HD]
    x = jnp.concatenate([x_cate, x_cont], axis=-1)               # [S*B, HD]

    # ---- LSTM weights (static, tile-aligned slices of the packed slab) ----
    w0_ih = wbig_ref[0:HD, :]                 # [H, 4H]
    w0_hh = wbig_ref[HD:2 * HD, :]            # [H, 4H]
    wcat1 = wbig_ref[2 * HD:4 * HD, :]        # [2H, 4H] = [W_ih1; W_hh1]

    # layer-1 input projection hoisted over the whole sequence (one MXU push)
    gates_x1 = jnp.dot(x, w0_ih, preferred_element_type=f32) + bias0   # [S*B, 4H]

    def _cell(g, c_prev):
        # gate order (i, f, o, g): sigmoid lanes contiguous, tanh last block
        sig = jax.nn.sigmoid(g)               # one full-width EUP push
        i_g = sig[:, 0:HD]
        f_g = sig[:, HD:2 * HD]
        o_g = sig[:, 2 * HD:3 * HD]
        g_g = jnp.tanh(g[:, 3 * HD:4 * HD])
        c = f_g * c_prev + i_g * g_g
        h = o_g * jnp.tanh(c)
        return h, c

    # ---- interleaved 2-layer recurrence, fully unrolled, vreg-carried ----
    h1 = jnp.zeros((B, HD), f32); c1 = jnp.zeros((B, HD), f32)
    h2 = jnp.zeros((B, HD), f32); c2 = jnp.zeros((B, HD), f32)
    for t in range(S):                        # static indices
        # layer-1 step t  (depends only on h1_{t-1})
        g1 = gates_x1[t * B:(t + 1) * B, :] + jnp.dot(
            h1, w0_hh, preferred_element_type=f32)               # [B, 4H]
        h1, c1 = _cell(g1, c1)
        # layer-2 step t  (depends on h1_t and h2_{t-1}); independent of
        # layer-1 step t+1, so the two chains overlap under the LLO scheduler.
        g2 = jnp.dot(jnp.concatenate([h1, h2], axis=-1), wcat1,
                     preferred_element_type=f32) + bias1          # [B, 4H]
        h2, c2 = _cell(g2, c2)
        # write-only output store, off the recurrence critical path
        out_ref[t * B:(t + 1) * B, :] = h2.astype(out_ref.dtype)


# --------------------- one-time parameter preparation ------------------------
def prepare_kernel_params(params):
    """Fuse / pack parameters for the kernel. Run ONCE, outside the jitted
    forward, so no per-call XLA ops rebuild them."""
    def perm_gates(w):
        # PyTorch LSTM gate order (i, f, g, o) -> kernel order (i, f, o, g)
        return jnp.concatenate([w[..., 0:HD], w[..., HD:2 * HD],
                                w[..., 3 * HD:4 * HD], w[..., 2 * HD:3 * HD]],
                               axis=-1)

    w_ih = perm_gates(params['w_ih_t'])                  # [L, H, 4H]
    w_hh = perm_gates(params['w_hh_t'])                  # [L, H, 4H]
    bias = perm_gates(params['b_ih'] + params['b_hh'])   # [L, 1, 4H]

    # fused block-diagonal comb/cont projection weight
    wp = jnp.zeros((FEAT, HD), jnp.float32)
    wp = wp.at[:4 * INTD, :HD2].set(params['w_comb'])
    wp = wp.at[4 * INTD:, HD2:].set(params['w_cont'])

    # stacked LSTM weight slab [4H, 4H]
    wbig = jnp.concatenate([w_ih[0], w_hh[0], w_ih[1], w_hh[1]], axis=0)

    # packed small vectors [3, 4H]
    bp = jnp.concatenate([params['b_comb'], params['b_cont']], axis=1)[0]
    gp = jnp.concatenate([params['g_comb'], params['g_cont']], axis=1)[0]
    bt = jnp.concatenate([params['beta_comb'], params['beta_cont']], axis=1)[0]
    small = jnp.zeros((3, 4 * HD), jnp.float32)
    small = small.at[0, :].set(bias[0, 0])
    small = small.at[1, :].set(bias[1, 0])
    small = small.at[2, 0:HD].set(bp)
    small = small.at[2, HD:2 * HD].set(gp)
    small = small.at[2, 2 * HD:3 * HD].set(bt)

    return {
        'emb_interaction': params['emb_interaction'],
        'emb_test':        params['emb_test'],
        'emb_question':    params['emb_question'],
        'emb_tag':         params['emb_tag'],
        'wp': wp, 'wbig': wbig, 'small': small,
        'fc_w': params['fc_w'], 'fc_b': params['fc_b'],
    }


# ------------------------------- wrapper ------------------------------------
def _embed_tokens(kparams, test, question, tag, interaction, elapsed):
    """Embedding lookups -> (s, b)-ordered token-major feature matrix."""
    b, s = test.shape
    embed = jnp.concatenate(
        [kparams['emb_interaction'][interaction],
         kparams['emb_test'][test],
         kparams['emb_question'][question],
         kparams['emb_tag'][tag]], axis=-1)                      # [B, S, 4*INTD]
    embed = embed.transpose(1, 0, 2).reshape(s * b, 4 * INTD)    # rows = (s, b)
    cont = jnp.zeros((s * b, CONT_PAD), jnp.float32)
    cont = cont.at[:, 0].set(elapsed.T.reshape(-1).astype(jnp.float32))
    return jnp.concatenate([embed, cont], axis=-1)               # [S*B, FEAT]


@jax.jit
def lstm_forward_pallas(kparams, test, question, tag, correct, mask,
                        interaction, elapsed):
    # correct / mask are accepted to match the PyTorch signature but are not
    # used by the forward computation (matches reference module behaviour).
    b, s = test.shape
    feat = _embed_tokens(kparams, test, question, tag, interaction, elapsed)

    vmem = pl.BlockSpec(memory_space=pltpu.MemorySpace.VMEM)
    hid = pl.pallas_call(
        _dkt_fused_kernel,
        out_shape=jax.ShapeDtypeStruct((s * b, HD), jnp.float32),
        in_specs=[vmem] * 4,
        out_specs=vmem,
    )(feat, kparams['wp'], kparams['wbig'], kparams['small'])    # [S*B, HD]

    # tiny fc = Linear(hd, 1) done wrapper-side on the lane-dense hidden slab
    out = hid @ kparams['fc_w'].T + kparams['fc_b'][0, 0]        # [S*B, 1]
    # rows are (s, b)-ordered -> [S, B] -> [B, S]
    return out.reshape(s, b).T


# --------------------------- reference (plain JAX) ---------------------------
def lstm_forward_reference(params, test, question, tag, correct, mask,
                           interaction, elapsed):
    HP = lax.Precision.HIGHEST
    b, s = test.shape
    embed = jnp.concatenate(
        [params['emb_interaction'][interaction],
         params['emb_test'][test],
         params['emb_question'][question],
         params['emb_tag'][tag]], axis=-1).reshape(b * s, 4 * INTD)
    cont = jnp.zeros((b * s, CONT_PAD), jnp.float32)
    cont = cont.at[:, 0].set(elapsed.reshape(-1).astype(jnp.float32))

    def ln(y, g, beta):
        mu = y.mean(-1, keepdims=True)
        var = ((y - mu) ** 2).mean(-1, keepdims=True)
        return (y - mu) / jnp.sqrt(var + LN_EPS) * g + beta

    cate = ln(jnp.dot(embed, params['w_comb'], precision=HP) + params['b_comb'],
              params['g_comb'], params['beta_comb'])
    contp = ln(jnp.dot(cont, params['w_cont'], precision=HP) + params['b_cont'],
               params['g_cont'], params['beta_cont'])
    X = jnp.concatenate([cate, contp], axis=-1).reshape(b, s, HD)

    layer_in = X
    for layer in range(N_LAYERS):
        h = jnp.zeros((b, HD), jnp.float32)
        c = jnp.zeros((b, HD), jnp.float32)
        outs = []
        for t in range(s):
            gates = (jnp.dot(layer_in[:, t], params['w_ih_t'][layer], precision=HP)
                     + jnp.dot(h, params['w_hh_t'][layer], precision=HP)
                     + params['b_ih'][layer] + params['b_hh'][layer])
            i = jax.nn.sigmoid(gates[:, :HD])
            f = jax.nn.sigmoid(gates[:, HD:2 * HD])
            g = jnp.tanh(gates[:, 2 * HD:3 * HD])
            o = jax.nn.sigmoid(gates[:, 3 * HD:])
            c = f * c + i * g
            h = o * jnp.tanh(c)
            outs.append(h)
        layer_in = jnp.stack(outs, axis=1)                       # [B, S, HD]

    out = jnp.sum(layer_in * params['fc_w'].reshape(1, 1, HD), axis=-1)
    out = out + params['fc_b'].reshape(())
    return out                                                   # [B, S]


# ------------------------------ parameter init -------------------------------
def init_params(key):
    ks = jax.random.split(key, 14)

    def nrm(k, shape, scale=0.1):
        return jax.random.normal(k, shape, jnp.float32) * scale

    return {
        'emb_interaction': nrm(ks[0], (3, INTD)),
        'emb_test':        nrm(ks[1], (N_TEST + 1, INTD)),
        'emb_question':    nrm(ks[2], (N_QUESTION + 1, INTD)),
        'emb_tag':         nrm(ks[3], (N_TAG + 1, INTD)),
        # comb_proj: Linear(4*intd, hd/2) + LayerNorm(hd/2)
        'w_comb':    nrm(ks[4], (4 * INTD, HD2)),
        'b_comb':    nrm(ks[5], (1, HD2)),
        'g_comb':    jnp.ones((1, HD2), jnp.float32),
        'beta_comb': jnp.zeros((1, HD2), jnp.float32),
        # cont_proj: Linear(1, hd/2) + LayerNorm(hd/2)  (contraction zero-padded to 8)
        'w_cont':    nrm(ks[6], (CONT_PAD, HD2)),
        'b_cont':    nrm(ks[7], (1, HD2)),
        'g_cont':    jnp.ones((1, HD2), jnp.float32),
        'beta_cont': jnp.zeros((1, HD2), jnp.float32),
        # nn.LSTM(hd, hd, 2, batch_first=True)  (weights stored pre-transposed [L, H, 4H],
        # gate order = PyTorch (i, f, g, o); the kernel-order permutation happens in prepare)
        'w_ih_t': nrm(ks[8], (N_LAYERS, HD, 4 * HD)),
        'w_hh_t': nrm(ks[9], (N_LAYERS, HD, 4 * HD)),
        'b_ih':   nrm(ks[10], (N_LAYERS, 1, 4 * HD)),
        'b_hh':   nrm(ks[11], (N_LAYERS, 1, 4 * HD)),
        # fc: Linear(hd, 1)
        'fc_w': nrm(ks[12], (1, HD)),
        'fc_b': nrm(ks[13], (1, 1)),
    }


# ----------------------------------- main ------------------------------------
if __name__ == "__main__":
    key = jax.random.PRNGKey(0)
    kp, k1, k2, k3, k4, k5, k6 = jax.random.split(key, 7)

    params = init_params(kp)
    kparams = prepare_kernel_params(params)   # one-time fusion, outside jit

    test        = jax.random.randint(k1, (B, S), 0, N_TEST + 1, dtype=jnp.int32)
    question    = jax.random.randint(k2, (B, S), 0, N_QUESTION + 1, dtype=jnp.int32)
    tag         = jax.random.randint(k3, (B, S), 0, N_TAG + 1, dtype=jnp.int32)
    correct     = jax.random.randint(k4, (B, S), 0, 2, dtype=jnp.int32)
    mask        = jnp.ones((B, S), jnp.int32)
    interaction = jax.random.randint(k5, (B, S), 0, 3, dtype=jnp.int32)
    elapsed     = jax.random.uniform(k6, (B, S), jnp.float32)

    out = lstm_forward_pallas(kparams, test, question, tag, correct, mask,
                              interaction, elapsed)
    out = jax.block_until_ready(out)
    assert out.shape == (B, S), out.shape

    ref = lstm_forward_reference(params, test, question, tag, correct, mask,
                                 interaction, elapsed)
    # MXU f32 matmul is not bit-identical to lax.Precision.HIGHEST; 5e-4 gives
    # headroom while still validating exact module semantics at these scales.
    assert jnp.allclose(out, ref, atol=5e-4, rtol=5e-4), (
        f"max abs err {jnp.max(jnp.abs(out - ref))}")

    print("KERNEL_OK")
</pallas_src>

<mosaic_0001>
module attributes {stable_mosaic.version = 11 : i64} {
  func.func @_dkt_fused_kernel(%arg0: memref<16x72xf32, #tpu.memory_space<vmem>>, %arg1: memref<72x32xf32, #tpu.memory_space<vmem>>, %arg2: memref<128x128xf32, #tpu.memory_space<vmem>>, %arg3: memref<3x128xf32, #tpu.memory_space<vmem>>, %arg4: memref<16x32xf32, #tpu.memory_space<vmem>>) attributes {dimension_semantics = [], scalar_prefetch = 0 : i64, scratch_operands = 0 : i64, tpu.core_type = #tpu.core_type<tc>} {
    %c0 = arith.constant 0 : index
    %c0_0 = arith.constant 0 : index
    %0 = vector.load %arg3[%c0, %c0_0] : memref<3x128xf32, #tpu.memory_space<vmem>>, vector<1x128xf32>
    %c1 = arith.constant 1 : index
    %c0_1 = arith.constant 0 : index
    %1 = vector.load %arg3[%c1, %c0_1] : memref<3x128xf32, #tpu.memory_space<vmem>>, vector<1x128xf32>
    %c2 = arith.constant 2 : index
    %c0_2 = arith.constant 0 : index
    %2 = vector.load %arg3[%c2, %c0_2] : memref<3x128xf32, #tpu.memory_space<vmem>>, vector<1x32xf32>
    %c2_3 = arith.constant 2 : index
    %c32 = arith.constant 32 : index
    %3 = vector.load %arg3[%c2_3, %c32] : memref<3x128xf32, #tpu.memory_space<vmem>>, vector<1x32xf32>
    %c2_4 = arith.constant 2 : index
    %c64 = arith.constant 64 : index
    %4 = vector.load %arg3[%c2_4, %c64] : memref<3x128xf32, #tpu.memory_space<vmem>>, vector<1x32xf32>
    %c0_5 = arith.constant 0 : index
    %c0_6 = arith.constant 0 : index
    %5 = vector.load %arg0[%c0_5, %c0_6] : memref<16x72xf32, #tpu.memory_space<vmem>>, vector<16x72xf32>
    %c0_7 = arith.constant 0 : index
    %c0_8 = arith.constant 0 : index
    %6 = vector.load %arg1[%c0_7, %c0_8] : memref<72x32xf32, #tpu.memory_space<vmem>>, vector<72x32xf32>
    %cst = arith.constant dense<0.000000e+00> : vector<16x32xf32>
    %7 = tpu.matmul %5, %6, %cst {dimension_numbers = #tpu.dot_dimension_numbers<[1], [0], [0], [1], [0, 0, 1, 1], [], []>} : vector<16x72xf32>, vector<72x32xf32>, vector<16x32xf32> -> vector<16x32xf32>
    %8 = vector.broadcast %2 : vector<1x32xf32> to vector<16x32xf32>
    %9 = arith.addf %7, %8 : vector<16x32xf32>
    %10 = vector.extract_strided_slice %9 {offsets = [0, 0], sizes = [16, 16], strides = [1, 1]} : vector<16x32xf32> to vector<16x16xf32>
    %cst_9 = arith.constant dense<0.000000e+00> : vector<16xf32>
    %11 = vector.multi_reduction <add>, %10, %cst_9 [1] : vector<16x16xf32> to vector<16xf32>
    %12 = vector.shape_cast %11 : vector<16xf32> to vector<16x1xf32>
    %cst_10 = arith.constant 1.600000e+01 : f32
    %13 = vector.broadcast %cst_10 : f32 to vector<16x1xf32>
    %14 = arith.divf %12, %13 : vector<16x1xf32>
    %15 = vector.broadcast %14 : vector<16x1xf32> to vector<16x16xf32>
    %16 = arith.subf %10, %15 : vector<16x16xf32>
    %17 = arith.mulf %16, %16 : vector<16x16xf32>
    %cst_11 = arith.constant dense<0.000000e+00> : vector<16xf32>
    %18 = vector.multi_reduction <add>, %17, %cst_11 [1] : vector<16x16xf32> to vector<16xf32>
    %19 = vector.shape_cast %18 : vector<16xf32> to vector<16x1xf32>
    %cst_12 = arith.constant 1.600000e+01 : f32
    %20 = vector.broadcast %cst_12 : f32 to vector<16x1xf32>
    %21 = arith.divf %19, %20 : vector<16x1xf32>
    %22 = vector.broadcast %14 : vector<16x1xf32> to vector<16x16xf32>
    %23 = arith.subf %10, %22 : vector<16x16xf32>
    %cst_13 = arith.constant 9.99999974E-6 : f32
    %24 = vector.broadcast %cst_13 : f32 to vector<16x1xf32>
    %25 = arith.addf %21, %24 : vector<16x1xf32>
    %26 = math.rsqrt %25 : vector<16x1xf32>
    %27 = vector.broadcast %26 : vector<16x1xf32> to vector<16x16xf32>
    %28 = arith.mulf %23, %27 : vector<16x16xf32>
    %29 = vector.extract_strided_slice %3 {offsets = [0, 0], sizes = [1, 16], strides = [1, 1]} : vector<1x32xf32> to vector<1x16xf32>
    %30 = vector.broadcast %29 : vector<1x16xf32> to vector<16x16xf32>
    %31 = arith.mulf %28, %30 : vector<16x16xf32>
    %32 = vector.extract_strided_slice %4 {offsets = [0, 0], sizes = [1, 16], strides = [1, 1]} : vector<1x32xf32> to vector<1x16xf32>
    %33 = vector.broadcast %32 : vector<1x16xf32> to vector<16x16xf32>
    %34 = arith.addf %31, %33 : vector<16x16xf32>
    %35 = vector.extract_strided_slice %9 {offsets = [0, 16], sizes = [16, 16], strides = [1, 1]} : vector<16x32xf32> to vector<16x16xf32>
    %cst_14 = arith.constant dense<0.000000e+00> : vector<16xf32>
    %36 = vector.multi_reduction <add>, %35, %cst_14 [1] : vector<16x16xf32> to vector<16xf32>
    %37 = vector.shape_cast %36 : vector<16xf32> to vector<16x1xf32>
    %cst_15 = arith.constant 1.600000e+01 : f32
    %38 = vector.broadcast %cst_15 : f32 to vector<16x1xf32>
    %39 = arith.divf %37, %38 : vector<16x1xf32>
    %40 = vector.broadcast %39 : vector<16x1xf32> to vector<16x16xf32>
    %41 = arith.subf %35, %40 : vector<16x16xf32>
    %42 = arith.mulf %41, %41 : vector<16x16xf32>
    %cst_16 = arith.constant dense<0.000000e+00> : vector<16xf32>
    %43 = vector.multi_reduction <add>, %42, %cst_16 [1] : vector<16x16xf32> to vector<16xf32>
    %44 = vector.shape_cast %43 : vector<16xf32> to vector<16x1xf32>
    %cst_17 = arith.constant 1.600000e+01 : f32
    %45 = vector.broadcast %cst_17 : f32 to vector<16x1xf32>
    %46 = arith.divf %44, %45 : vector<16x1xf32>
    %47 = vector.broadcast %39 : vector<16x1xf32> to vector<16x16xf32>
    %48 = arith.subf %35, %47 : vector<16x16xf32>
    %cst_18 = arith.constant 9.99999974E-6 : f32
    %49 = vector.broadcast %cst_18 : f32 to vector<16x1xf32>
    %50 = arith.addf %46, %49 : vector<16x1xf32>
    %51 = math.rsqrt %50 : vector<16x1xf32>
    %52 = vector.broadcast %51 : vector<16x1xf32> to vector<16x16xf32>
    %53 = arith.mulf %48, %52 : vector<16x16xf32>
    %54 = vector.extract_strided_slice %3 {offsets = [0, 16], sizes = [1, 16], strides = [1, 1]} : vector<1x32xf32> to vector<1x16xf32>
    %55 = vector.broadcast %54 : vector<1x16xf32> to vector<16x16xf32>
    %56 = arith.mulf %53, %55 : vector<16x16xf32>
    %57 = vector.extract_strided_slice %4 {offsets = [0, 16], sizes = [1, 16], strides = [1, 1]} : vector<1x32xf32> to vector<1x16xf32>
    %58 = vector.broadcast %57 : vector<1x16xf32> to vector<16x16xf32>
    %59 = arith.addf %56, %58 : vector<16x16xf32>
    %60 = tpu.concatenate %34, %59 in 1 : vector<16x16xf32>, vector<16x16xf32> -> vector<16x32xf32>
    %c0_19 = arith.constant 0 : index
    %c0_20 = arith.constant 0 : index
    %61 = vector.load %arg2[%c0_19, %c0_20] : memref<128x128xf32, #tpu.memory_space<vmem>>, vector<32x128xf32>
    %c32_21 = arith.constant 32 : index
    %c0_22 = arith.constant 0 : index
    %62 = vector.load %arg2[%c32_21, %c0_22] : memref<128x128xf32, #tpu.memory_space<vmem>>, vector<32x128xf32>
    %c64_23 = arith.constant 64 : index
    %c0_24 = arith.constant 0 : index
    %63 = vector.load %arg2[%c64_23, %c0_24] : memref<128x128xf32, #tpu.memory_space<vmem>>, vector<64x128xf32>
    %cst_25 = arith.constant dense<0.000000e+00> : vector<16x128xf32>
    %64 = tpu.matmul %60, %61, %cst_25 {dimension_numbers = #tpu.dot_dimension_numbers<[1], [0], [0], [1], [0, 0, 1, 1], [], []>} : vector<16x32xf32>, vector<32x128xf32>, vector<16x128xf32> -> vector<16x128xf32>
    %65 = vector.broadcast %0 : vector<1x128xf32> to vector<16x128xf32>
    %66 = arith.addf %64, %65 : vector<16x128xf32>
    %cst_26 = arith.constant 0.000000e+00 : f32
    %67 = vector.broadcast %cst_26 : f32 to vector<2x32xf32>
    %cst_27 = arith.constant 0.000000e+00 : f32
    %68 = vector.broadcast %cst_27 : f32 to vector<2x32xf32>
    %cst_28 = arith.constant 0.000000e+00 : f32
    %69 = vector.broadcast %cst_28 : f32 to vector<2x32xf32>
    %cst_29 = arith.constant 0.000000e+00 : f32
    %70 = vector.broadcast %cst_29 : f32 to vector<2x32xf32>
    %71 = vector.extract_strided_slice %66 {offsets = [0, 0], sizes = [2, 128], strides = [1, 1]} : vector<16x128xf32> to vector<2x128xf32>
    %cst_30 = arith.constant dense<0.000000e+00> : vector<2x128xf32>
    %72 = tpu.matmul %67, %62, %cst_30 {dimension_numbers = #tpu.dot_dimension_numbers<[1], [0], [0], [1], [0, 0, 1, 1], [], []>} : vector<2x32xf32>, vector<32x128xf32>, vector<2x128xf32> -> vector<2x128xf32>
    %73 = arith.addf %71, %72 : vector<2x128xf32>
    %74 = arith.negf %73 : vector<2x128xf32>
    %75 = math.exp %74 : vector<2x128xf32>
    %cst_31 = arith.constant 1.000000e+00 : f32
    %76 = vector.broadcast %cst_31 : f32 to vector<2x128xf32>
    %77 = arith.addf %76, %75 : vector<2x128xf32>
    %78 = arith.divf %76, %77 : vector<2x128xf32>
    %79 = vector.extract_strided_slice %78 {offsets = [0, 0], sizes = [2, 32], strides = [1, 1]} : vector<2x128xf32> to vector<2x32xf32>
    %80 = vector.extract_strided_slice %78 {offsets = [0, 32], sizes = [2, 32], strides = [1, 1]} : vector<2x128xf32> to vector<2x32xf32>
    %81 = vector.extract_strided_slice %78 {offsets = [0, 64], sizes = [2, 32], strides = [1, 1]} : vector<2x128xf32> to vector<2x32xf32>
    %82 = vector.extract_strided_slice %73 {offsets = [0, 96], sizes = [2, 32], strides = [1, 1]} : vector<2x128xf32> to vector<2x32xf32>
    %83 = math.tanh %82 : vector<2x32xf32>
    %84 = arith.mulf %80, %68 : vector<2x32xf32>
    %85 = arith.mulf %79, %83 : vector<2x32xf32>
    %86 = arith.addf %84, %85 : vector<2x32xf32>
    %87 = math.tanh %86 : vector<2x32xf32>
    %88 = arith.mulf %81, %87 : vector<2x32xf32>
    %89 = tpu.concatenate %88, %69 in 1 : vector<2x32xf32>, vector<2x32xf32> -> vector<2x64xf32>
    %cst_32 = arith.constant dense<0.000000e+00> : vector<2x128xf32>
    %90 = tpu.matmul %89, %63, %cst_32 {dimension_numbers = #tpu.dot_dimension_numbers<[1], [0], [0], [1], [0, 0, 1, 1], [], []>} : vector<2x64xf32>, vector<64x128xf32>, vector<2x128xf32> -> vector<2x128xf32>
    %91 = vector.broadcast %1 : vector<1x128xf32> to vector<2x128xf32>
    %92 = arith.addf %90, %91 : vector<2x128xf32>
    %93 = arith.negf %92 : vector<2x128xf32>
    %94 = math.exp %93 : vector<2x128xf32>
    %cst_33 = arith.constant 1.000000e+00 : f32
    %95 = vector.broadcast %cst_33 : f32 to vector<2x128xf32>
    %96 = arith.addf %95, %94 : vector<2x128xf32>
    %97 = arith.divf %95, %96 : vector<2x128xf32>
    %98 = vector.extract_strided_slice %97 {offsets = [0, 0], sizes = [2, 32], strides = [1, 1]} : vector<2x128xf32> to vector<2x32xf32>
    %99 = vector.extract_strided_slice %97 {offsets = [0, 32], sizes = [2, 32], strides = [1, 1]} : vector<2x128xf32> to vector<2x32xf32>
    %100 = vector.extract_strided_slice %97 {offsets = [0, 64], sizes = [2, 32], strides = [1, 1]} : vector<2x128xf32> to vector<2x32xf32>
    %101 = vector.extract_strided_slice %92 {offsets = [0, 96], sizes = [2, 32], strides = [1, 1]} : vector<2x128xf32> to vector<2x32xf32>
    %102 = math.tanh %101 : vector<2x32xf32>
    %103 = arith.mulf %99, %70 : vector<2x32xf32>
    %104 = arith.mulf %98, %102 : vector<2x32xf32>
    %105 = arith.addf %103, %104 : vector<2x32xf32>
    %106 = math.tanh %105 : vector<2x32xf32>
    %107 = arith.mulf %100, %106 : vector<2x32xf32>
    %c0_34 = arith.constant 0 : index
    %c0_35 = arith.constant 0 : index
    %108 = vector.load %arg4[%c0_34, %c0_35] : memref<16x32xf32, #tpu.memory_space<vmem>>, vector<2x32xf32>
    tpu.vector_store %arg4[%c0_34, %c0_35], %107 {strides = array<i32>} : memref<16x32xf32, #tpu.memory_space<vmem>>, vector<2x32xf32>,
    %109 = vector.extract_strided_slice %66 {offsets = [2, 0], sizes = [2, 128], strides = [1, 1]} : vector<16x128xf32> to vector<2x128xf32>
    %cst_36 = arith.constant dense<0.000000e+00> : vector<2x128xf32>
    %110 = tpu.matmul %88, %62, %cst_36 {dimension_numbers = #tpu.dot_dimension_numbers<[1], [0], [0], [1], [0, 0, 1, 1], [], []>} : vector<2x32xf32>, vector<32x128xf32>, vector<2x128xf32> -> vector<2x128xf32>
    %111 = arith.addf %109, %110 : vector<2x128xf32>
    %112 = arith.negf %111 : vector<2x128xf32>
    %113 = math.exp %112 : vector<2x128xf32>
    %cst_37 = arith.constant 1.000000e+00 : f32
    %114 = vector.broadcast %cst_37 : f32 to vector<2x128xf32>
    %115 = arith.addf %114, %113 : vector<2x128xf32>
    %116 = arith.divf %114, %115 : vector<2x128xf32>
    %117 = vector.extract_strided_slice %116 {offsets = [0, 0], sizes = [2, 32], strides = [1, 1]} : vector<2x128xf32> to vector<2x32xf32>
    %118 = vector.extract_strided_slice %116 {offsets = [0, 32], sizes = [2, 32], strides = [1, 1]} : vector<2x128xf32> to vector<2x32xf32>
    %119 = vector.extract_strided_slice %116 {offsets = [0, 64], sizes = [2, 32], strides = [1, 1]} : vector<2x128xf32> to vector<2x32xf32>
    %120 = vector.extract_strided_slice %111 {offsets = [0, 96], sizes = [2, 32], strides = [1, 1]} : vector<2x128xf32> to vector<2x32xf32>
    %121 = math.tanh %120 : vector<2x32xf32>
    %122 = arith.mulf %118, %86 : vector<2x32xf32>
    %123 = arith.mulf %117, %121 : vector<2x32xf32>
    %124 = arith.addf %122, %123 : vector<2x32xf32>
    %125 = math.tanh %124 : vector<2x32xf32>
    %126 = arith.mulf %119, %125 : vector<2x32xf32>
    %127 = tpu.concatenate %126, %107 in 1 : vector<2x32xf32>, vector<2x32xf32> -> vector<2x64xf32>
    %cst_38 = arith.constant dense<0.000000e+00> : vector<2x128xf32>
    %128 = tpu.matmul %127, %63, %cst_38 {dimension_numbers = #tpu.dot_dimension_numbers<[1], [0], [0], [1], [0, 0, 1, 1], [], []>} : vector<2x64xf32>, vector<64x128xf32>, vector<2x128xf32> -> vector<2x128xf32>
    %129 = vector.broadcast %1 : vector<1x128xf32> to vector<2x128xf32>
    %130 = arith.addf %128, %129 : vector<2x128xf32>
    %131 = arith.negf %130 : vector<2x128xf32>
    %132 = math.exp %131 : vector<2x128xf32>
    %cst_39 = arith.constant 1.000000e+00 : f32
    %133 = vector.broadcast %cst_39 : f32 to vector<2x128xf32>
    %134 = arith.addf %133, %132 : vector<2x128xf32>
    %135 = arith.divf %133, %134 : vector<2x128xf32>
    %136 = vector.extract_strided_slice %135 {offsets = [0, 0], sizes = [2, 32], strides = [1, 1]} : vector<2x128xf32> to vector<2x32xf32>
    %137 = vector.extract_strided_slice %135 {offsets = [0, 32], sizes = [2, 32], strides = [1, 1]} : vector<2x128xf32> to vector<2x32xf32>
    %138 = vector.extract_strided_slice %135 {offsets = [0, 64], sizes = [2, 32], strides = [1, 1]} : vector<2x128xf32> to vector<2x32xf32>
    %139 = vector.extract_strided_slice %130 {offsets = [0, 96], sizes = [2, 32], strides = [1, 1]} : vector<2x128xf32> to vector<2x32xf32>
    %140 = math.tanh %139 : vector<2x32xf32>
    %141 = arith.mulf %137, %105 : vector<2x32xf32>
    %142 = arith.mulf %136, %140 : vector<2x32xf32>
    %143 = arith.addf %141, %142 : vector<2x32xf32>
    %144 = math.tanh %143 : vector<2x32xf32>
    %145 = arith.mulf %138, %144 : vector<2x32xf32>
    %c2_40 = arith.constant 2 : index
    %c0_41 = arith.constant 0 : index
    %146 = vector.load %arg4[%c2_40, %c0_41] : memref<16x32xf32, #tpu.memory_space<vmem>>, vector<2x32xf32>
    tpu.vector_store %arg4[%c2_40, %c0_41], %145 {strides = array<i32>} : memref<16x32xf32, #tpu.memory_space<vmem>>, vector<2x32xf32>,
    %147 = vector.extract_strided_slice %66 {offsets = [4, 0], sizes = [2, 128], strides = [1, 1]} : vector<16x128xf32> to vector<2x128xf32>
    %cst_42 = arith.constant dense<0.000000e+00> : vector<2x128xf32>
    %148 = tpu.matmul %126, %62, %cst_42 {dimension_numbers = #tpu.dot_dimension_numbers<[1], [0], [0], [1], [0, 0, 1, 1], [], []>} : vector<2x32xf32>, vector<32x128xf32>, vector<2x128xf32> -> vector<2x128xf32>
    %149 = arith.addf %147, %148 : vector<2x128xf32>
    %150 = arith.negf %149 : vector<2x128xf32>
    %151 = math.exp %150 : vector<2x128xf32>
    %cst_43 = arith.constant 1.000000e+00 : f32
    %152 = vector.broadcast %cst_43 : f32 to vector<2x128xf32>
    %153 = arith.addf %152, %151 : vector<2x128xf32>
    %154 = arith.divf %152, %153 : vector<2x128xf32>
    %155 = vector.extract_strided_slice %154 {offsets = [0, 0], sizes = [2, 32], strides = [1, 1]} : vector<2x128xf32> to vector<2x32xf32>
    %156 = vector.extract_strided_slice %154 {offsets = [0, 32], sizes = [2, 32], strides = [1, 1]} : vector<2x128xf32> to vector<2x32xf32>
    %157 = vector.extract_strided_slice %154 {offsets = [0, 64], sizes = [2, 32], strides = [1, 1]} : vector<2x128xf32> to vector<2x32xf32>
    %158 = vector.extract_strided_slice %149 {offsets = [0, 96], sizes = [2, 32], strides = [1, 1]} : vector<2x128xf32> to vector<2x32xf32>
    %159 = math.tanh %158 : vector<2x32xf32>
    %160 = arith.mulf %156, %124 : vector<2x32xf32>
    %161 = arith.mulf %155, %159 : vector<2x32xf32>
    %162 = arith.addf %160, %161 : vector<2x32xf32>
    %163 = math.tanh %162 : vector<2x32xf32>
    %164 = arith.mulf %157, %163 : vector<2x32xf32>
    %165 = tpu.concatenate %164, %145 in 1 : vector<2x32xf32>, vector<2x32xf32> -> vector<2x64xf32>
    %cst_44 = arith.constant dense<0.000000e+00> : vector<2x128xf32>
    %166 = tpu.matmul %165, %63, %cst_44 {dimension_numbers = #tpu.dot_dimension_numbers<[1], [0], [0], [1], [0, 0, 1, 1], [], []>} : vector<2x64xf32>, vector<64x128xf32>, vector<2x128xf32> -> vector<2x128xf32>
    %167 = vector.broadcast %1 : vector<1x128xf32> to vector<2x128xf32>
    %168 = arith.addf %166, %167 : vector<2x128xf32>
    %169 = arith.negf %168 : vector<2x128xf32>
    %170 = math.exp %169 : vector<2x128xf32>
    %cst_45 = arith.constant 1.000000e+00 : f32
    %171 = vector.broadcast %cst_45 : f32 to vector<2x128xf32>
    %172 = arith.addf %171, %170 : vector<2x128xf32>
    %173 = arith.divf %171, %172 : vector<2x128xf32>
    %174 = vector.extract_strided_slice %173 {offsets = [0, 0], sizes = [2, 32], strides = [1, 1]} : vector<2x128xf32> to vector<2x32xf32>
    %175 = vector.extract_strided_slice %173 {offsets = [0, 32], sizes = [2, 32], strides = [1, 1]} : vector<2x128xf32> to vector<2x32xf32>
    %176 = vector.extract_strided_slice %173 {offsets = [0, 64], sizes = [2, 32], strides = [1, 1]} : vector<2x128xf32> to vector<2x32xf32>
    %177 = vector.extract_strided_slice %168 {offsets = [0, 96], sizes = [2, 32], strides = [1, 1]} : vector<2x128xf32> to vector<2x32xf32>
    %178 = math.tanh %177 : vector<2x32xf32>
    %179 = arith.mulf %175, %143 : vector<2x32xf32>
    %180 = arith.mulf %174, %178 : vector<2x32xf32>
    %181 = arith.addf %179, %180 : vector<2x32xf32>
    %182 = math.tanh %181 : vector<2x32xf32>
    %183 = arith.mulf %176, %182 : vector<2x32xf32>
    %c4 = arith.constant 4 : index
    %c0_46 = arith.constant 0 : index
    %184 = vector.load %arg4[%c4, %c0_46] : memref<16x32xf32, #tpu.memory_space<vmem>>, vector<2x32xf32>
    tpu.vector_store %arg4[%c4, %c0_46], %183 {strides = array<i32>} : memref<16x32xf32, #tpu.memory_space<vmem>>, vector<2x32xf32>,
    %185 = vector.extract_strided_slice %66 {offsets = [6, 0], sizes = [2, 128], strides = [1, 1]} : vector<16x128xf32> to vector<2x128xf32>
    %cst_47 = arith.constant dense<0.000000e+00> : vector<2x128xf32>
    %186 = tpu.matmul %164, %62, %cst_47 {dimension_numbers = #tpu.dot_dimension_numbers<[1], [0], [0], [1], [0, 0, 1, 1], [], []>} : vector<2x32xf32>, vector<32x128xf32>, vector<2x128xf32> -> vector<2x128xf32>
    %187 = arith.addf %185, %186 : vector<2x128xf32>
    %188 = arith.negf %187 : vector<2x128xf32>
    %189 = math.exp %188 : vector<2x128xf32>
    %cst_48 = arith.constant 1.000000e+00 : f32
    %190 = vector.broadcast %cst_48 : f32 to vector<2x128xf32>
    %191 = arith.addf %190, %189 : vector<2x128xf32>
    %192 = arith.divf %190, %191 : vector<2x128xf32>
    %193 = vector.extract_strided_slice %192 {offsets = [0, 0], sizes = [2, 32], strides = [1, 1]} : vector<2x128xf32> to vector<2x32xf32>
    %194 = vector.extract_strided_slice %192 {offsets = [0, 32], sizes = [2, 32], strides = [1, 1]} : vector<2x128xf32> to vector<2x32xf32>
    %195 = vector.extract_strided_slice %192 {offsets = [0, 64], sizes = [2, 32], strides = [1, 1]} : vector<2x128xf32> to vector<2x32xf32>
    %196 = vector.extract_strided_slice %187 {offsets = [0, 96], sizes = [2, 32], strides = [1, 1]} : vector<2x128xf32> to vector<2x32xf32>
    %197 = math.tanh %196 : vector<2x32xf32>
    %198 = arith.mulf %194, %162 : vector<2x32xf32>
    %199 = arith.mulf %193, %197 : vector<2x32xf32>
    %200 = arith.addf %198, %199 : vector<2x32xf32>
    %201 = math.tanh %200 : vector<2x32xf32>
    %202 = arith.mulf %195, %201 : vector<2x32xf32>
    %203 = tpu.concatenate %202, %183 in 1 : vector<2x32xf32>, vector<2x32xf32> -> vector<2x64xf32>
    %cst_49 = arith.constant dense<0.000000e+00> : vector<2x128xf32>
    %204 = tpu.matmul %203, %63, %cst_49 {dimension_numbers = #tpu.dot_dimension_numbers<[1], [0], [0], [1], [0, 0, 1, 1], [], []>} : vector<2x64xf32>, vector<64x128xf32>, vector<2x128xf32> -> vector<2x128xf32>
    %205 = vector.broadcast %1 : vector<1x128xf32> to vector<2x128xf32>
    %206 = arith.addf %204, %205 : vector<2x128xf32>
    %207 = arith.negf %206 : vector<2x128xf32>
    %208 = math.exp %207 : vector<2x128xf32>
    %cst_50 = arith.constant 1.000000e+00 : f32
    %209 = vector.broadcast %cst_50 : f32 to vector<2x128xf32>
    %210 = arith.addf %209, %208 : vector<2x128xf32>
    %211 = arith.divf %209, %210 : vector<2x128xf32>
    %212 = vector.extract_strided_slice %211 {offsets = [0, 0], sizes = [2, 32], strides = [1, 1]} : vector<2x128xf32> to vector<2x32xf32>
    %213 = vector.extract_strided_slice %211 {offsets = [0, 32], sizes = [2, 32], strides = [1, 1]} : vector<2x128xf32> to vector<2x32xf32>
    %214 = vector.extract_strided_slice %211 {offsets = [0, 64], sizes = [2, 32], strides = [1, 1]} : vector<2x128xf32> to vector<2x32xf32>
    %215 = vector.extract_strided_slice %206 {offsets = [0, 96], sizes = [2, 32], strides = [1, 1]} : vector<2x128xf32> to vector<2x32xf32>
    %216 = math.tanh %215 : vector<2x32xf32>
    %217 = arith.mulf %213, %181 : vector<2x32xf32>
    %218 = arith.mulf %212, %216 : vector<2x32xf32>
    %219 = arith.addf %217, %218 : vector<2x32xf32>
    %220 = math.tanh %219 : vector<2x32xf32>
    %221 = arith.mulf %214, %220 : vector<2x32xf32>
    %c6 = arith.constant 6 : index
    %c0_51 = arith.constant 0 : index
    %222 = vector.load %arg4[%c6, %c0_51] : memref<16x32xf32, #tpu.memory_space<vmem>>, vector<2x32xf32>
    tpu.vector_store %arg4[%c6, %c0_51], %221 {strides = array<i32>} : memref<16x32xf32, #tpu.memory_space<vmem>>, vector<2x32xf32>,
    %223 = vector.extract_strided_slice %66 {offsets = [8, 0], sizes = [2, 128], strides = [1, 1]} : vector<16x128xf32> to vector<2x128xf32>
    %cst_52 = arith.constant dense<0.000000e+00> : vector<2x128xf32>
    %224 = tpu.matmul %202, %62, %cst_52 {dimension_numbers = #tpu.dot_dimension_numbers<[1], [0], [0], [1], [0, 0, 1, 1], [], []>} : vector<2x32xf32>, vector<32x128xf32>, vector<2x128xf32> -> vector<2x128xf32>
    %225 = arith.addf %223, %224 : vector<2x128xf32>
    %226 = arith.negf %225 : vector<2x128xf32>
    %227 = math.exp %226 : vector<2x128xf32>
    %cst_53 = arith.constant 1.000000e+00 : f32
    %228 = vector.broadcast %cst_53 : f32 to vector<2x128xf32>
    %229 = arith.addf %228, %227 : vector<2x128xf32>
    %230 = arith.divf %228, %229 : vector<2x128xf32>
    %231 = vector.extract_strided_slice %230 {offsets = [0, 0], sizes = [2, 32], strides = [1, 1]} : vector<2x128xf32> to vector<2x32xf32>
    %232 = vector.extract_strided_slice %230 {offsets = [0, 32], sizes = [2, 32], strides = [1, 1]} : vector<2x128xf32> to vector<2x32xf32>
    %233 = vector.extract_strided_slice %230 {offsets = [0, 64], sizes = [2, 32], strides = [1, 1]} : vector<2x128xf32> to vector<2x32xf32>
    %234 = vector.extract_strided_slice %225 {offsets = [0, 96], sizes = [2, 32], strides = [1, 1]} : vector<2x128xf32> to vector<2x32xf32>
    %235 = math.tanh %234 : vector<2x32xf32>
    %236 = arith.mulf %232, %200 : vector<2x32xf32>
    %237 = arith.mulf %231, %235 : vector<2x32xf32>
    %238 = arith.addf %236, %237 : vector<2x32xf32>
    %239 = math.tanh %238 : vector<2x32xf32>
    %240 = arith.mulf %233, %239 : vector<2x32xf32>
    %241 = tpu.concatenate %240, %221 in 1 : vector<2x32xf32>, vector<2x32xf32> -> vector<2x64xf32>
    %cst_54 = arith.constant dense<0.000000e+00> : vector<2x128xf32>
    %242 = tpu.matmul %241, %63, %cst_54 {dimension_numbers = #tpu.dot_dimension_numbers<[1], [0], [0], [1], [0, 0, 1, 1], [], []>} : vector<2x64xf32>, vector<64x128xf32>, vector<2x128xf32> -> vector<2x128xf32>
    %243 = vector.broadcast %1 : vector<1x128xf32> to vector<2x128xf32>
    %244 = arith.addf %242, %243 : vector<2x128xf32>
    %245 = arith.negf %244 : vector<2x128xf32>
    %246 = math.exp %245 : vector<2x128xf32>
    %cst_55 = arith.constant 1.000000e+00 : f32
    %247 = vector.broadcast %cst_55 : f32 to vector<2x128xf32>
    %248 = arith.addf %247, %246 : vector<2x128xf32>
    %249 = arith.divf %247, %248 : vector<2x128xf32>
    %250 = vector.extract_strided_slice %249 {offsets = [0, 0], sizes = [2, 32], strides = [1, 1]} : vector<2x128xf32> to vector<2x32xf32>
    %251 = vector.extract_strided_slice %249 {offsets = [0, 32], sizes = [2, 32], strides = [1, 1]} : vector<2x128xf32> to vector<2x32xf32>
    %252 = vector.extract_strided_slice %249 {offsets = [0, 64], sizes = [2, 32], strides = [1, 1]} : vector<2x128xf32> to vector<2x32xf32>
    %253 = vector.extract_strided_slice %244 {offsets = [0, 96], sizes = [2, 32], strides = [1, 1]} : vector<2x128xf32> to vector<2x32xf32>
    %254 = math.tanh %253 : vector<2x32xf32>
    %255 = arith.mulf %251, %219 : vector<2x32xf32>
    %256 = arith.mulf %250, %254 : vector<2x32xf32>
    %257 = arith.addf %255, %256 : vector<2x32xf32>
    %258 = math.tanh %257 : vector<2x32xf32>
    %259 = arith.mulf %252, %258 : vector<2x32xf32>
    %c8 = arith.constant 8 : index
    %c0_56 = arith.constant 0 : index
    %260 = vector.load %arg4[%c8, %c0_56] : memref<16x32xf32, #tpu.memory_space<vmem>>, vector<2x32xf32>
    tpu.vector_store %arg4[%c8, %c0_56], %259 {strides = array<i32>} : memref<16x32xf32, #tpu.memory_space<vmem>>, vector<2x32xf32>,
    %261 = vector.extract_strided_slice %66 {offsets = [10, 0], sizes = [2, 128], strides = [1, 1]} : vector<16x128xf32> to vector<2x128xf32>
    %cst_57 = arith.constant dense<0.000000e+00> : vector<2x128xf32>
    %262 = tpu.matmul %240, %62, %cst_57 {dimension_numbers = #tpu.dot_dimension_numbers<[1], [0], [0], [1], [0, 0, 1, 1], [], []>} : vector<2x32xf32>, vector<32x128xf32>, vector<2x128xf32> -> vector<2x128xf32>
    %263 = arith.addf %261, %262 : vector<2x128xf32>
    %264 = arith.negf %263 : vector<2x128xf32>
    %265 = math.exp %264 : vector<2x128xf32>
    %cst_58 = arith.constant 1.000000e+00 : f32
    %266 = vector.broadcast %cst_58 : f32 to vector<2x128xf32>
    %267 = arith.addf %266, %265 : vector<2x128xf32>
    %268 = arith.divf %266, %267 : vector<2x128xf32>
    %269 = vector.extract_strided_slice %268 {offsets = [0, 0], sizes = [2, 32], strides = [1, 1]} : vector<2x128xf32> to vector<2x32xf32>
    %270 = vector.extract_strided_slice %268 {offsets = [0, 32], sizes = [2, 32], strides = [1, 1]} : vector<2x128xf32> to vector<2x32xf32>
    %271 = vector.extract_strided_slice %268 {offsets = [0, 64], sizes = [2, 32], strides = [1, 1]} : vector<2x128xf32> to vector<2x32xf32>
    %272 = vector.extract_strided_slice %263 {offsets = [0, 96], sizes = [2, 32], strides = [1, 1]} : vector<2x128xf32> to vector<2x32xf32>
    %273 = math.tanh %272 : vector<2x32xf32>
    %274 = arith.mulf %270, %238 : vector<2x32xf32>
    %275 = arith.mulf %269, %273 : vector<2x32xf32>
    %276 = arith.addf %274, %275 : vector<2x32xf32>
    %277 = math.tanh %276 : vector<2x32xf32>
    %278 = arith.mulf %271, %277 : vector<2x32xf32>
    %279 = tpu.concatenate %278, %259 in 1 : vector<2x32xf32>, vector<2x32xf32> -> vector<2x64xf32>
    %cst_59 = arith.constant dense<0.000000e+00> : vector<2x128xf32>
    %280 = tpu.matmul %279, %63, %cst_59 {dimension_numbers = #tpu.dot_dimension_numbers<[1], [0], [0], [1], [0, 0, 1, 1], [], []>} : vector<2x64xf32>, vector<64x128xf32>, vector<2x128xf32> -> vector<2x128xf32>
    %281 = vector.broadcast %1 : vector<1x128xf32> to vector<2x128xf32>
    %282 = arith.addf %280, %281 : vector<2x128xf32>
    %283 = arith.negf %282 : vector<2x128xf32>
    %284 = math.exp %283 : vector<2x128xf32>
    %cst_60 = arith.constant 1.000000e+00 : f32
    %285 = vector.broadcast %cst_60 : f32 to vector<2x128xf32>
    %286 = arith.addf %285, %284 : vector<2x128xf32>
    %287 = arith.divf %285, %286 : vector<2x128xf32>
    %288 = vector.extract_strided_slice %287 {offsets = [0, 0], sizes = [2, 32], strides = [1, 1]} : vector<2x128xf32> to vector<2x32xf32>
    %289 = vector.extract_strided_slice %287 {offsets = [0, 32], sizes = [2, 32], strides = [1, 1]} : vector<2x128xf32> to vector<2x32xf32>
    %290 = vector.extract_strided_slice %287 {offsets = [0, 64], sizes = [2, 32], strides = [1, 1]} : vector<2x128xf32> to vector<2x32xf32>
    %291 = vector.extract_strided_slice %282 {offsets = [0, 96], sizes = [2, 32], strides = [1, 1]} : vector<2x128xf32> to vector<2x32xf32>
    %292 = math.tanh %291 : vector<2x32xf32>
    %293 = arith.mulf %289, %257 : vector<2x32xf32>
    %294 = arith.mulf %288, %292 : vector<2x32xf32>
    %295 = arith.addf %293, %294 : vector<2x32xf32>
    %296 = math.tanh %295 : vector<2x32xf32>
    %297 = arith.mulf %290, %296 : vector<2x32xf32>
    %c10 = arith.constant 10 : index
    %c0_61 = arith.constant 0 : index
    %298 = vector.load %arg4[%c10, %c0_61] : memref<16x32xf32, #tpu.memory_space<vmem>>, vector<2x32xf32>
    tpu.vector_store %arg4[%c10, %c0_61], %297 {strides = array<i32>} : memref<16x32xf32, #tpu.memory_space<vmem>>, vector<2x32xf32>,
    %299 = vector.extract_strided_slice %66 {offsets = [12, 0], sizes = [2, 128], strides = [1, 1]} : vector<16x128xf32> to vector<2x128xf32>
    %cst_62 = arith.constant dense<0.000000e+00> : vector<2x128xf32>
    %300 = tpu.matmul %278, %62, %cst_62 {dimension_numbers = #tpu.dot_dimension_numbers<[1], [0], [0], [1], [0, 0, 1, 1], [], []>} : vector<2x32xf32>, vector<32x128xf32>, vector<2x128xf32> -> vector<2x128xf32>
    %301 = arith.addf %299, %300 : vector<2x128xf32>
    %302 = arith.negf %301 : vector<2x128xf32>
    %303 = math.exp %302 : vector<2x128xf32>
    %cst_63 = arith.constant 1.000000e+00 : f32
    %304 = vector.broadcast %cst_63 : f32 to vector<2x128xf32>
    %305 = arith.addf %304, %303 : vector<2x128xf32>
    %306 = arith.divf %304, %305 : vector<2x128xf32>
    %307 = vector.extract_strided_slice %306 {offsets = [0, 0], sizes = [2, 32], strides = [1, 1]} : vector<2x128xf32> to vector<2x32xf32>
    %308 = vector.extract_strided_slice %306 {offsets = [0, 32], sizes = [2, 32], strides = [1, 1]} : vector<2x128xf32> to vector<2x32xf32>
    %309 = vector.extract_strided_slice %306 {offsets = [0, 64], sizes = [2, 32], strides = [1, 1]} : vector<2x128xf32> to vector<2x32xf32>
    %310 = vector.extract_strided_slice %301 {offsets = [0, 96], sizes = [2, 32], strides = [1, 1]} : vector<2x128xf32> to vector<2x32xf32>
    %311 = math.tanh %310 : vector<2x32xf32>
    %312 = arith.mulf %308, %276 : vector<2x32xf32>
    %313 = arith.mulf %307, %311 : vector<2x32xf32>
    %314 = arith.addf %312, %313 : vector<2x32xf32>
    %315 = math.tanh %314 : vector<2x32xf32>
    %316 = arith.mulf %309, %315 : vector<2x32xf32>
    %317 = tpu.concatenate %316, %297 in 1 : vector<2x32xf32>, vector<2x32xf32> -> vector<2x64xf32>
    %cst_64 = arith.constant dense<0.000000e+00> : vector<2x128xf32>
    %318 = tpu.matmul %317, %63, %cst_64 {dimension_numbers = #tpu.dot_dimension_numbers<[1], [0], [0], [1], [0, 0, 1, 1], [], []>} : vector<2x64xf32>, vector<64x128xf32>, vector<2x128xf32> -> vector<2x128xf32>
    %319 = vector.broadcast %1 : vector<1x128xf32> to vector<2x128xf32>
    %320 = arith.addf %318, %319 : vector<2x128xf32>
    %321 = arith.negf %320 : vector<2x128xf32>
    %322 = math.exp %321 : vector<2x128xf32>
    %cst_65 = arith.constant 1.000000e+00 : f32
    %323 = vector.broadcast %cst_65 : f32 to vector<2x128xf32>
    %324 = arith.addf %323, %322 : vector<2x128xf32>
    %325 = arith.divf %323, %324 : vector<2x128xf32>
    %326 = vector.extract_strided_slice %325 {offsets = [0, 0], sizes = [2, 32], strides = [1, 1]} : vector<2x128xf32> to vector<2x32xf32>
    %327 = vector.extract_strided_slice %325 {offsets = [0, 32], sizes = [2, 32], strides = [1, 1]} : vector<2x128xf32> to vector<2x32xf32>
    %328 = vector.extract_strided_slice %325 {offsets = [0, 64], sizes = [2, 32], strides = [1, 1]} : vector<2x128xf32> to vector<2x32xf32>
    %329 = vector.extract_strided_slice %320 {offsets = [0, 96], sizes = [2, 32], strides = [1, 1]} : vector<2x128xf32> to vector<2x32xf32>
    %330 = math.tanh %329 : vector<2x32xf32>
    %331 = arith.mulf %327, %295 : vector<2x32xf32>
    %332 = arith.mulf %326, %330 : vector<2x32xf32>
    %333 = arith.addf %331, %332 : vector<2x32xf32>
    %334 = math.tanh %333 : vector<2x32xf32>
    %335 = arith.mulf %328, %334 : vector<2x32xf32>
    %c12 = arith.constant 12 : index
    %c0_66 = arith.constant 0 : index
    %336 = vector.load %arg4[%c12, %c0_66] : memref<16x32xf32, #tpu.memory_space<vmem>>, vector<2x32xf32>
    tpu.vector_store %arg4[%c12, %c0_66], %335 {strides = array<i32>} : memref<16x32xf32, #tpu.memory_space<vmem>>, vector<2x32xf32>,
    %337 = vector.extract_strided_slice %66 {offsets = [14, 0], sizes = [2, 128], strides = [1, 1]} : vector<16x128xf32> to vector<2x128xf32>
    %cst_67 = arith.constant dense<0.000000e+00> : vector<2x128xf32>
    %338 = tpu.matmul %316, %62, %cst_67 {dimension_numbers = #tpu.dot_dimension_numbers<[1], [0], [0], [1], [0, 0, 1, 1], [], []>} : vector<2x32xf32>, vector<32x128xf32>, vector<2x128xf32> -> vector<2x128xf32>
    %339 = arith.addf %337, %338 : vector<2x128xf32>
    %340 = arith.negf %339 : vector<2x128xf32>
    %341 = math.exp %340 : vector<2x128xf32>
    %cst_68 = arith.constant 1.000000e+00 : f32
    %342 = vector.broadcast %cst_68 : f32 to vector<2x128xf32>
    %343 = arith.addf %342, %341 : vector<2x128xf32>
    %344 = arith.divf %342, %343 : vector<2x128xf32>
    %345 = vector.extract_strided_slice %344 {offsets = [0, 0], sizes = [2, 32], strides = [1, 1]} : vector<2x128xf32> to vector<2x32xf32>
    %346 = vector.extract_strided_slice %344 {offsets = [0, 32], sizes = [2, 32], strides = [1, 1]} : vector<2x128xf32> to vector<2x32xf32>
    %347 = vector.extract_strided_slice %344 {offsets = [0, 64], sizes = [2, 32], strides = [1, 1]} : vector<2x128xf32> to vector<2x32xf32>
    %348 = vector.extract_strided_slice %339 {offsets = [0, 96], sizes = [2, 32], strides = [1, 1]} : vector<2x128xf32> to vector<2x32xf32>
    %349 = math.tanh %348 : vector<2x32xf32>
    %350 = arith.mulf %346, %314 : vector<2x32xf32>
    %351 = arith.mulf %345, %349 : vector<2x32xf32>
    %352 = arith.addf %350, %351 : vector<2x32xf32>
    %353 = math.tanh %352 : vector<2x32xf32>
    %354 = arith.mulf %347, %353 : vector<2x32xf32>
    %355 = tpu.concatenate %354, %335 in 1 : vector<2x32xf32>, vector<2x32xf32> -> vector<2x64xf32>
    %cst_69 = arith.constant dense<0.000000e+00> : vector<2x128xf32>
    %356 = tpu.matmul %355, %63, %cst_69 {dimension_numbers = #tpu.dot_dimension_numbers<[1], [0], [0], [1], [0, 0, 1, 1], [], []>} : vector<2x64xf32>, vector<64x128xf32>, vector<2x128xf32> -> vector<2x128xf32>
    %357 = vector.broadcast %1 : vector<1x128xf32> to vector<2x128xf32>
    %358 = arith.addf %356, %357 : vector<2x128xf32>
    %359 = arith.negf %358 : vector<2x128xf32>
    %360 = math.exp %359 : vector<2x128xf32>
    %cst_70 = arith.constant 1.000000e+00 : f32
    %361 = vector.broadcast %cst_70 : f32 to vector<2x128xf32>
    %362 = arith.addf %361, %360 : vector<2x128xf32>
    %363 = arith.divf %361, %362 : vector<2x128xf32>
    %364 = vector.extract_strided_slice %363 {offsets = [0, 0], sizes = [2, 32], strides = [1, 1]} : vector<2x128xf32> to vector<2x32xf32>
    %365 = vector.extract_strided_slice %363 {offsets = [0, 32], sizes = [2, 32], strides = [1, 1]} : vector<2x128xf32> to vector<2x32xf32>
    %366 = vector.extract_strided_slice %363 {offsets = [0, 64], sizes = [2, 32], strides = [1, 1]} : vector<2x128xf32> to vector<2x32xf32>
    %367 = vector.extract_strided_slice %358 {offsets = [0, 96], sizes = [2, 32], strides = [1, 1]} : vector<2x128xf32> to vector<2x32xf32>
    %368 = math.tanh %367 : vector<2x32xf32>
    %369 = arith.mulf %365, %333 : vector<2x32xf32>
    %370 = arith.mulf %364, %368 : vector<2x32xf32>
    %371 = arith.addf %369, %370 : vector<2x32xf32>
    %372 = math.tanh %371 : vector<2x32xf32>
    %373 = arith.mulf %366, %372 : vector<2x32xf32>
    %c14 = arith.constant 14 : index
    %c0_71 = arith.constant 0 : index
    %374 = vector.load %arg4[%c14, %c0_71] : memref<16x32xf32, #tpu.memory_space<vmem>>, vector<2x32xf32>
    tpu.vector_store %arg4[%c14, %c0_71], %373 {strides = array<i32>} : memref<16x32xf32, #tpu.memory_space<vmem>>, vector<2x32xf32>,
    return
  }
}

</mosaic_0001>

<bundles_post_ra>
// kernel: lstm_forward_pallas.1
= control target key start
LH: loop header
LB: loop body
LE: loop exit
PB: predicated region body
PF: predicated region fallthrough
CT: control target
= control target key end

     0   :  { %vm35_vm0 = vcmask 588800   ;;  %s2786_s13 = smov 112   ;;  %vm117_vm1 = vcmask 130048   ;;  %v2789_v54 = vmov 0.0|0.0   ;;  %vm2790_vm2 = vmmov 0   ;;  %s2792_s6 = smov 32   ;;  %s3299_s1 = inlined_call_operand.vmem [shape: f32[72,32], index: 1, kind: input, shape index: {}]   ;;  %s3300_s0 = inlined_call_operand.vmem [shape: f32[16,72], index: 0, kind: input, shape index: {}]   ;;  %s3301_s3 = inlined_call_operand.vmem [shape: f32[3,128], index: 3, kind: input, shape index: {}]   ;;  %s3302_s2 = inlined_call_operand.vmem [shape: f32[128,128], index: 2, kind: input, shape index: {}]   ;;  %s3303_s4 = inlined_call_operand.vmem [shape: f32[16,32], index: 4, kind: output, shape index: {}]  }
   0x1   :  { %v22_v0 = vld [vmem:[%s3299_s1] sm:$0xff]  ;;  %v23_v1 = vld [vmem:[%s3299_s1 + $0x8] sm:$0xff]  ;;  %v24_v2 = vld [vmem:[%s3299_s1 + $0x10] sm:$0xff]  ;;  %v2791_v55 = vmov 0.0   ;;  %vm224_vm3 = vcmask 261120   ;;  %vm413_vm4 = vcmask 523264  }
   0x2   :  { %v2475_v3 = vpack.c.bf16 %v23_v1, %v22_v0  ;;  %v25_v4 = vld [vmem:[%s3299_s1 + $0x18] sm:$0xff]  ;;  %v26_v6 = vld [vmem:[%s3299_s1 + $0x20] sm:$0xff]  ;;  %v27_v7 = vld [vmem:[%s3299_s1 + $0x28] sm:$0xff]  ;;  %vm515_vm5 = vcmask 254976  }
   0x3   :  { %v2479_v5 = vpack.c.bf16 %v25_v4, %v24_v2  ;;  %v20_v8 = vld [vmem:[%s3300_s0] sm:$0xff]  ;;  %v2483_v9 = vpack.c.bf16 %v27_v7, %v26_v6  ;;  %v28_v10 = vld [vmem:[%s3299_s1 + $0x30] sm:$0xff]  ;;  %v29_v11 = vld [vmem:[%s3299_s1 + $0x38] sm:$0xff] }
   0x4   :  { %2476 = vmatprep.subr.bf16.mxu0 %v2475_v3  ;;  %2221 = vmatprep.mubr.msk.f32.mxu0 %vm35_vm0, %v20_v8  ;;  %v2487_v12 = vpack.c.bf16 %v29_v11, %v28_v10  ;;  %v30_v13 = vld [vmem:[%s3299_s1 + $0x40] sm:$0xff]  ;;  %v21_v14 = vld [vmem:[%s3300_s0 + $0x8] sm:$0xff]  ;;  %s2787_s0 = smov 64   ;;  %s2788_s1 = smov 96   ;;  %v206_v51 = vld [vmem:[%s3302_s2 + $0x10] sm:$0xff] }
   0x5   :  { %2478 = vmatpush3.bf16.msra.mxu0 %v2475_v3  ;;  %v2036_v15 = vld [vmem:[%s3301_s3 + $0x2] ss:$0 sm:$0xff]  ;;  %v205_v49 = vld [vmem:[%s3302_s2 + $0x8] sm:$0xff]  ;;  %v207_v52 = vld [vmem:[%s3302_s2 + $0x18] sm:$0xff] }
   0x6   :  { %2480 = vmatprep.subr.bf16.mxu0 %v2479_v5  ;;  %v204_v48 = vld [vmem:[%s3302_s2] sm:$0xff]  ;;  %v2495_v53 = vpack.c.bf16 %v207_v52, %v206_v51  ;;  %v215_v52 = vld [vmem:[%s3302_s2 + $0x58] sm:$0xff] }
   0x7   :  { %v2491_v50 = vpack.c.bf16 %v205_v49, %v204_v48  ;;  %v212_v48 = vld [vmem:[%s3302_s2 + $0x40] sm:$0xff]  ;;  %v213_v49 = vld [vmem:[%s3302_s2 + $0x48] sm:$0xff] }
   0x8   :  { %v2938_v51 = vpack.c.bf16 %v213_v49, %v212_v48 }
   0x9   :  { %2482 = vmatpush3.bf16.msra.mxu0 %v2479_v5  ;;  %2492 = vmatprep.subr.bf16.mxu1 %v2491_v50 }
   0xa   :  { %2484 = vmatprep.subr.bf16.mxu0 %v2483_v9  ;;  %2494 = vmatpush3.bf16.msra.mxu1 %v2491_v50  ;;  %v214_v50 = vld [vmem:[%s3302_s2 + $0x50] sm:$0xff] }
   0xb   :  { %2496 = vmatprep.subr.bf16.mxu1 %v2495_v53 }
   0xd   :  { %2486 = vmatpush3.bf16.msra.mxu0 %v2483_v9 }
   0xe   :  { %2488 = vmatprep.subr.bf16.mxu0 %v2487_v12  ;;  %2498 = vmatpush3.bf16.msra.mxu1 %v2495_v53  ;;  %v2944_v53 = vpack.c.bf16 %v215_v52, %v214_v50 }
   0xf   :  { %2499 = vmatprep.subr.bf16.mxu1 %v2789_v54 }
  0x11   :  { %2490 = vmatpush3.bf16.msra.mxu0 %v2487_v12 }
  0x12   :  { %2219 = vmatprep.subr.mxu0 %v30_v13 }
  0x15   :  { %2220 = vmatpush3.msra.mxu0 %v30_v13 }
  0x16   :  { %2222 = vmatmul.mubr.msk.f32.vlgmr.msra.gmra.mrb[0].mxu0 %vm35_vm0, %v21_v14  ;;  %2523 = vmatprep.subr.bf16.mxu0 %v2789_v54 }
  0x17   :  { %2292 = vmatprep.mubr.msk.f32.mxu0 %vm2790_vm2, %v2791_v55  ;;  %2525 = vmatpush3.bf16.msra.mxu0 %v2938_v51 }
  0x18   :  { %2526 = vmatprep.subr.bf16.mxu0 %v2789_v54 }
  0x1b   :  { %2528 = vmatpush3.bf16.msra.mxu0 %v2944_v53 }
  0x1c   :  { %2529 = vmatprep.subr.bf16.mxu0 %v2789_v54 }
  0xe9   :  { %v2223_v16 = vpop.f32.mrb[0].mxu0 }
  0xea   :  { %v108_v17 = vpop.f32.mrb[1].mxu0  ;;  %v114_v19 = vadd.f32 %v2223_v16, %v2036_v15 }
  0xeb   :  { %v109_v18 = vadd.f32 %v2036_v15, %v108_v17 }
  0xec   :  { %v121_v25 = vsel %vm117_vm1, %v114_v19, 0.0 }
  0xed   :  { %158 = vrot.lane.b32.xlu0 %v109_v18, %s2786_s13  ;;  %v118_v20 = vsel %vm117_vm1, %v109_v18, 0.0 }
  0xf1   :  { %160 = vrot.lane.b32.xlu0 %v114_v19, %s2786_s13 }
 0x110   :  { %119 = vadd.xlane.f32.xlu0 %v118_v20 }
 0x15f   :  { %v159_v21 = vpop.permute.xlu0 %158 }
 0x160   :  { %v164_v22 = vsel %vm117_vm1, %v159_v21, 0.0 }
 0x161   :  { %165 = vadd.xlane.f32.xlu1 %v164_v22 }
 0x163   :  { %v161_v23 = vpop.permute.xlu0 %160 }
 0x164   :  { %v167_v24 = vsel %vm117_vm1, %v161_v23, 0.0 }
 0x165   :  { %168 = vadd.xlane.f32.xlu1 %v167_v24 }
 0x169   :  { %122 = vadd.xlane.f32.xlu1 %v121_v25 }
 0x19d   :  { %v120_v39 = vpop.xlane.xlu0 %119 }
 0x19e   :  { %v125_v40 = vmul.f32 0.0625, %v120_v39 }
 0x1a0   :  { %v127_v41 = vsub.f32 %v109_v18, %v125_v40 }
 0x1a2   :  { %v129_v42 = vmul.f32 %v127_v41, %v127_v41 }
 0x1a4   :  { %v131_v43 = vsel %vm117_vm1, %v129_v42, 0.0 }
 0x1ee   :  { %v166_v26 = vpop.xlane.xlu1 %165 }
 0x1ef   :  { %v170_v27 = vmul.f32 0.0625, %v166_v26  ;;  %v210_v26 = vld [vmem:[%s3302_s2 + $0x30] sm:$0xff] }
 0x1f1   :  { %v2860_v28 = vsub.f32 %v109_v18, %v170_v27  ;;  %v208_v18 = vld [vmem:[%s3302_s2 + $0x20] sm:$0xff]  ;;  %v211_v27 = vld [vmem:[%s3302_s2 + $0x38] sm:$0xff] }
 0x1f2   :  { %v169_v29 = vpop.xlane.xlu1 %168 }
 0x1f3   :  { %v171_v30 = vmul.f32 0.0625, %v169_v29  ;;  %v174_v31 = vmul.f32 %v2860_v28, %v2860_v28  ;;  %v2906_v29 = vpack.c.bf16 %v211_v27, %v210_v26 }
 0x1f5   :  { %v173_v32 = vsub.f32 %v114_v19, %v171_v30  ;;  %178 = vrot.lane.b32.xlu1 %v174_v31, %s2786_s13  ;;  %v2039_v30 = vld [vmem:[%s3301_s3] ss:$0 sm:$0xff] }
 0x1f6   :  { %v123_v33 = vpop.xlane.xlu1 %122 }
 0x1f7   :  { %v126_v34 = vmul.f32 0.0625, %v123_v33  ;;  %v175_v35 = vmul.f32 %v173_v32, %v173_v32 }
 0x1f9   :  { %v128_v36 = vsub.f32 %v114_v19, %v126_v34  ;;  %180 = vrot.lane.b32.xlu1 %v175_v35, %s2786_s13  ;;  %v209_v19 = vld [vmem:[%s3302_s2 + $0x28] sm:$0xff] }
 0x1fa   :  { %v2893_v24 = vpack.c.bf16 %v209_v19, %v208_v18 }
 0x1fb   :  { %v130_v37 = vmul.f32 %v128_v36, %v128_v36 }
 0x1fd   :  { %v134_v38 = vsel %vm117_vm1, %v130_v37, 0.0 }
 0x1fe   :  { %135 = vadd.xlane.f32.xlu0 %v134_v38 }
 0x21d   :  { %132 = vadd.xlane.f32.xlu1 %v131_v43 }
 0x22e   :  { %151 = vrot.lane.b32.xlu1 %v2036_v15, %s2787_s0 }
 0x267   :  { %v179_v44 = vpop.permute.xlu1 %178 }
 0x268   :  { %v184_v47 = vsel %vm117_vm1, %v179_v44, 0.0 }
 0x26b   :  { %v181_v45 = vpop.permute.xlu1 %180 }
 0x26c   :  { %v187_v46 = vsel %vm117_vm1, %v181_v45, 0.0 }
 0x26d   :  { %188 = vadd.xlane.f32.xlu0 %v187_v46 }
 0x271   :  { %185 = vadd.xlane.f32.xlu0 %v184_v47 }
 0x287   :  { %146 = vrot.lane.b32.xlu0 %v2036_v15, %s2788_s1 }
 0x28b   :  { %v136_v57 = vpop.xlane.xlu0 %135 }
 0x28c   :  { %v138_v59 = vmul.f32 0.0625, %v136_v57  ;;  %v217_v57 = vld [vmem:[%s3302_s2 + $0x68] sm:$0xff] }
 0x28e   :  { %v140_v63 = vadd.f32 1e-05, %v138_v59  ;;  %v218_v59 = vld [vmem:[%s3302_s2 + $0x70] sm:$0xff] }
 0x2aa   :  { %v133_v56 = vpop.xlane.xlu1 %132 }
 0x2ab   :  { %v137_v58 = vmul.f32 0.0625, %v133_v56  ;;  %v216_v56 = vld [vmem:[%s3302_s2 + $0x60] sm:$0xff] }
 0x2ad   :  { %v139_v60 = vadd.f32 1e-05, %v137_v58  ;;  %v2956_v58 = vpack.c.bf16 %v217_v57, %v216_v56 }
 0x2ae   :  { %v152_v16 = vpop.permute.xlu1 %151 }
 0x2af   :  { %2650 = vrsqrt.f32 %v139_v60  ;;  %v219_v60 = vld [vmem:[%s3302_s2 + $0x78] sm:$0xff]  ;;  %2531 = vmatpush3.bf16.msra.mxu0 %v2956_v58 }
 0x2b0   :  { %2532 = vmatprep.subr.bf16.mxu0 %v2789_v54 }
 0x2b9   :  { %v2651_v4 = vpop.eup %2650 }
 0x2ba   :  { %v143_v9 = vmul.f32 %v2651_v4, %v127_v41 }
 0x2fa   :  { %v189_v61 = vpop.xlane.xlu0 %188 }
 0x2fb   :  { %v191_v62 = vmul.f32 0.0625, %v189_v61 }
 0x2fd   :  { %v193_v0 = vadd.f32 1e-05, %v191_v62  ;;  %v2969_v62 = vpack.c.bf16 %v219_v60, %v218_v59 }
 0x2fe   :  { %v186_v1 = vpop.xlane.xlu0 %185 }
 0x2ff   :  { %2652 = vrsqrt.f32 %v193_v0  ;;  %v190_v2 = vmul.f32 0.0625, %v186_v1  ;;  %2534 = vmatpush3.bf16.msra.mxu0 %v2969_v62 }
 0x300   :  { %2654 = vrsqrt.f32 %v140_v63  ;;  %2553 = vmatprep.subr.bf16.mxu0 %v2789_v54 }
 0x301   :  { %v192_v3 = vadd.f32 1e-05, %v190_v2 }
 0x302   :  { %v147_v8 = vpop.permute.xlu0 %146 }
 0x303   :  { %2656 = vrsqrt.f32 %v192_v3  ;;  %v149_v14 = vmul.f32 %v147_v8, %v143_v9  ;;  %v2997_v3 = vld [vmem:[%s3301_s3 + $0x1] ss:$0 sm:$0xff] }
 0x305   :  { %v154_v21 = vadd.f32 %v152_v16, %v149_v14 }
 0x309   :  { %v2653_v5 = vpop.eup %2652 }
 0x30a   :  { %v2655_v6 = vpop.eup %2654  ;;  %v197_v7 = vmul.f32 %v2653_v5, %v173_v32 }
 0x30b   :  { %v144_v11 = vmul.f32 %v2655_v6, %v128_v36 }
 0x30c   :  { %v199_v12 = vmul.f32 %v197_v7, %v147_v8 }
 0x30d   :  { %v2657_v10 = vpop.eup %2656  ;;  %v150_v15 = vmul.f32 %v147_v8, %v144_v11 }
 0x30e   :  { %v196_v13 = vmul.f32 %v2657_v10, %v2860_v28  ;;  %v201_v20 = vadd.f32 %v199_v12, %v152_v16 }
 0x30f   :  { %v155_v23 = vadd.f32 %v152_v16, %v150_v15 }
 0x310   :  { %v198_v17 = vmul.f32 %v196_v13, %v147_v8 }
 0x311   :  { %v203_v28 = vsel %vm117_vm1, %v155_v23, %v201_v20 }
 0x312   :  { %v200_v22 = vadd.f32 %v198_v17, %v152_v16 }
 0x314   :  { %v202_v25 = vsel %vm117_vm1, %v154_v21, %v200_v22 }
 0x315   :  { %2232 = vmatprep.mubr.msk.f32.mxu1 %vm224_vm3, %v202_v25 }
 0x316   :  { %2233 = vmatmul.mubr.msk.f32.vlgmr.msra.gmra.mrb[0].mxu1 %vm224_vm3, %v203_v28 }
 0x317   :  { %2501 = vmatpush3.bf16.msra.mxu1 %v2893_v24  ;;  %2243 = vmatprep.mubr.msk.f32.mxu1 %vm2790_vm2, %v2791_v55 }
 0x318   :  { %2502 = vmatprep.subr.bf16.mxu1 %v2789_v54 }
 0x31b   :  { %2504 = vmatpush3.bf16.msra.mxu1 %v2906_v29 }
 0x31c   :  { %2505 = vmatprep.subr.bf16.mxu1 %v2789_v54 }
 0x31e   :  { %2244 = vmatmul.mubr.f32.vlgmr.msra.gmra.mrb[2].mxu1 %v2791_v55 }
 0x31f   :  { %2262 = vmatprep.mubr.msk.f32.mxu1 %vm2790_vm2, %v2791_v55  ;;  %2507 = vmatpush3.bf16.msra.mxu1 %v2938_v51 }
 0x320   :  { %2508 = vmatprep.subr.bf16.mxu1 %v2789_v54 }
 0x323   :  { %2510 = vmatpush3.bf16.msra.mxu1 %v2944_v53 }
 0x324   :  { %2511 = vmatprep.subr.bf16.mxu1 %v2789_v54 }
 0x327   :  { %2513 = vmatpush3.bf16.msra.mxu1 %v2956_v58 }
 0x328   :  { %2514 = vmatprep.subr.bf16.mxu1 %v2789_v54 }
 0x32b   :  { %2516 = vmatpush3.bf16.msra.mxu1 %v2969_v62 }
 0x32c   :  { %2517 = vmatprep.subr.bf16.mxu1 %v2789_v54 }
 0x3e9   :  { %v2234_v31 = vpop.f32.mrb[0].mxu1 }
 0x3ea   :  { %v2919_v32 = vadd.f32 %v2234_v31, %v2039_v30  ;;  %v297_v33 = vpop.f32.mrb[1].mxu1 }
 0x3eb   :  { %v2921_v34 = vadd.f32 %v2039_v30, %v297_v33 }
 0x3f1   :  { %v375_v35 = vpop.f32.mrb[2].mxu1 }
 0x3f2   :  { %v379_v36 = vadd.f32 %v375_v35, %v2921_v34  ;;  %v2245_v37 = vpop.f32.mrb[3].mxu1 }
 0x3f4   :  { %2658 = vtanh.f32 %v379_v36  ;;  %v2042_v39 = vmul.f32 -1.442695, %v379_v36 }
 0x3f6   :  { %2660 = vpow2.f32 %v2042_v39 }
 0x3fe   :  { %v2659_v38 = vpop.eup %2658 }
 0x3ff   :  { %389 = vrot.lane.b32.xlu0 %v2659_v38, %s2792_s6 }
 0x400   :  { %v2661_v40 = vpop.eup %2660 }
 0x401   :  { %v383_v41 = vadd.f32 1.0, %v2661_v40 }
 0x403   :  { %2662 = vrcp.f32 %v383_v41 }
 0x40d   :  { %v2663_v42 = vpop.eup %2662 }
 0x40e   :  { %v387_v45 = vmul.f32 0.0, %v2663_v42 }
 0x471   :  { %v390_v43 = vpop.permute.xlu0 %389 }
 0x472   :  { %v392_v44 = vmul.f32 %v2663_v42, %v390_v43 }
 0x474   :  { %394 = vrot.lane.b32.xlu0 %v392_v44, %s2792_s6 }
 0x4e6   :  { %v395_v46 = vpop.permute.xlu0 %394 }
 0x4e7   :  { %v2926_v47 = vadd.f32 %v395_v46, %v387_v45 }
 0x4e9   :  { %2664 = vtanh.f32 %v2926_v47  ;;  %v601_v30 = vrot.slane %v2926_v47, 6 }
 0x4f3   :  { %v2665_v61 = vpop.eup %2664 }
 0x4f4   :  { %400 = vrot.lane.b32.xlu0 %v2665_v61, %s2792_s6 }
 0x566   :  { %v401_v63 = vpop.permute.xlu0 %400 }
 0x567   :  { %v403_v0 = vmul.f32 %v2663_v42, %v401_v63 }
 0x569   :  { %405 = vrot.lane.b32.xlu0 %v403_v0, %s2787_s0 }
 0x5db   :  { %v406_v1 = vpop.permute.xlu0 %405 }
 0x5dc   :  { %v408_v2 = vsel %vm224_vm3, %v406_v1, 0.0 }
 0x5dd   :  { %2263 = vmatmul.mubr.msk.f32.vlgmr.msra.gmra.mrb[4].mxu1 %vm413_vm4, %v408_v2 }
 0x5de   :  { %2519 = vmatpush3.bf16.msra.mxu1 %v2893_v24  ;;  %2273 = vmatprep.mubr.msk.f32.mxu1 %vm2790_vm2, %v2791_v55 }
 0x5df   :  { %2520 = vmatprep.subr.bf16.mxu1 %v2789_v54 }
 0x5e2   :  { %2522 = vmatpush3.bf16.msra.mxu1 %v2906_v29 }
 0x5e3   :  { %2535 = vmatprep.subr.bf16.mxu1 %v2789_v54 }
 0x5e5   :  { %2274 = vmatmul.mubr.msk.f32.vlgmr.msra.gmra.mrb[6].mxu1 %vm224_vm3, %v406_v1 }
 0x5e6   :  { %2537 = vmatpush3.bf16.msra.mxu1 %v2893_v24  ;;  %2303 = vmatprep.mubr.msk.f32.mxu1 %vm2790_vm2, %v2791_v55 }
 0x5e7   :  { %2538 = vmatprep.subr.bf16.mxu1 %v2789_v54 }
 0x5ea   :  { %2540 = vmatpush3.bf16.msra.mxu1 %v2906_v29 }
 0x5eb   :  { %2541 = vmatprep.subr.bf16.mxu1 %v2789_v54 }
 0x6b0   :  { %v483_v4 = vpop.f32.mrb[4].mxu1 }
 0x6b1   :  { %v484_v5 = vadd.f32 %v2997_v3, %v483_v4  ;;  %v2264_v6 = vpop.f32.mrb[5].mxu1 }
 0x6b3   :  { %2666 = vtanh.f32 %v484_v5  ;;  %v2045_v13 = vmul.f32 -1.442695, %v484_v5 }
 0x6b8   :  { %v585_v7 = vpop.f32.mrb[6].mxu1 }
 0x6b9   :  { %v590_v8 = vrot.slane %v585_v7, 6  ;;  %v2275_v9 = vpop.f32.mrb[7].mxu1 }
 0x6bb   :  { %v592_v10 = vadd.f32 %v590_v8, %v2921_v34 }
 0x6bd   :  { %v2667_v11 = vpop.eup %2666  ;;  %2668 = vtanh.f32 %v592_v10  ;;  %v2047_v14 = vmul.f32 -1.442695, %v592_v10 }
 0x6be   :  { %496 = vrot.lane.b32.xlu1 %v2667_v11, %s2792_s6  ;;  %2670 = vpow2.f32 %v2045_v13 }
 0x6bf   :  { %2672 = vpow2.f32 %v2047_v14 }
 0x6c7   :  { %v2669_v12 = vpop.eup %2668 }
 0x6c8   :  { %605 = vrot.lane.b32.xlu0 %v2669_v12, %s2792_s6  ;;  %v2671_v15 = vpop.eup %2670 }
 0x6c9   :  { %v490_v16 = vadd.f32 1.0, %v2671_v15  ;;  %v2673_v17 = vpop.eup %2672 }
 0x6ca   :  { %v596_v18 = vadd.f32 1.0, %v2673_v17 }
 0x6cb   :  { %2674 = vrcp.f32 %v490_v16 }
 0x6cc   :  { %2676 = vrcp.f32 %v596_v18 }
 0x6d5   :  { %v2675_v19 = vpop.eup %2674 }
 0x6d6   :  { %v2677_v22 = vpop.eup %2676  ;;  %v494_v26 = vmul.f32 0.0, %v2675_v19 }
 0x6d7   :  { %v603_v31 = vmul.f32 %v2677_v22, %v601_v30 }
 0x730   :  { %v497_v20 = vpop.permute.xlu1 %496 }
 0x731   :  { %v499_v21 = vmul.f32 %v2675_v19, %v497_v20 }
 0x733   :  { %501 = vrot.lane.b32.xlu1 %v499_v21, %s2792_s6 }
 0x73a   :  { %v606_v23 = vpop.permute.xlu0 %605 }
 0x73b   :  { %v608_v25 = vmul.f32 %v2677_v22, %v606_v23 }
 0x73d   :  { %610 = vrot.lane.b32.xlu0 %v608_v25, %s2792_s6 }
 0x7a5   :  { %v502_v27 = vpop.permute.xlu1 %501 }
 0x7a6   :  { %v3005_v28 = vadd.f32 %v502_v27, %v494_v26 }
 0x7a8   :  { %2678 = vtanh.f32 %v3005_v28 }
 0x7af   :  { %v611_v33 = vpop.permute.xlu0 %610 }
 0x7b0   :  { %v3009_v35 = vadd.f32 %v611_v33, %v603_v31 }
 0x7b2   :  { %v2679_v36 = vpop.eup %2678  ;;  %2680 = vtanh.f32 %v3009_v35  ;;  %v819_v14 = vrot.slane %v3009_v35, 6 }
 0x7b3   :  { %507 = vrot.lane.b32.xlu1 %v2679_v36, %s2792_s6 }
 0x7bc   :  { %v2681_v37 = vpop.eup %2680 }
 0x7bd   :  { %616 = vrot.lane.b32.xlu0 %v2681_v37, %s2792_s6 }
 0x825   :  { %v508_v38 = vpop.permute.xlu1 %507 }
 0x826   :  { %v3014_v39 = vmul.f32 %v2675_v19, %v508_v38 }
 0x828   :  { %v624_v40 = vrot.slane %v3014_v39, 6 }
 0x82a   :  { %625 = vrot.lane.b32.xlu0 %v624_v40, %s2788_s1 }
 0x82f   :  { %v617_v41 = vpop.permute.xlu0 %616 }
 0x830   :  { %v619_v42 = vmul.f32 %v2677_v22, %v617_v41 }
 0x832   :  { %621 = vrot.lane.b32.xlu1 %v619_v42, %s2787_s0  ;;  %v732_v43 = vrot.slane %v619_v42, 2 }
 0x836   :  { %733 = vrot.lane.b32.xlu1 %v732_v43, %s2787_s0 }
 0x89c   :  { %v626_v44 = vpop.permute.xlu0 %625 }
 0x8a4   :  { %v622_v45 = vpop.permute.xlu1 %621 }
 0x8a5   :  { %v628_v46 = vsel %vm224_vm3, %v622_v45, %v626_v44 }
 0x8a6   :  { %v630_v47 = vrot.slane %v628_v46, 2 }
 0x8a8   :  { %v734_v48 = vpop.permute.xlu1 %733  ;;  %2293 = vmatmul.mubr.msk.f32.vlgmr.msra.gmra.mrb[2].mxu0 %vm413_vm4, %v630_v47 }
 0x8a9   :  { %2304 = vmatmul.mubr.msk.f32.vlgmr.msra.gmra.mrb[8].mxu1 %vm224_vm3, %v734_v48  ;;  %2555 = vmatpush3.bf16.msra.mxu0 %v2893_v24 }
 0x8aa   :  { %2543 = vmatpush3.bf16.msra.mxu1 %v2938_v51  ;;  %2556 = vmatprep.subr.bf16.mxu0 %v2789_v54 }
 0x8ab   :  { %2544 = vmatprep.subr.bf16.mxu1 %v2789_v54  ;;  %2322 = vmatprep.mubr.msk.f32.mxu1 %vm2790_vm2, %v2791_v55 }
 0x8ac   :  { %2333 = vmatprep.mubr.msk.f32.mxu0 %vm2790_vm2, %v2791_v55 }
 0x8ad   :  { %2558 = vmatpush3.bf16.msra.mxu0 %v2906_v29 }
 0x8ae   :  { %2546 = vmatpush3.bf16.msra.mxu1 %v2944_v53  ;;  %2559 = vmatprep.subr.bf16.mxu0 %v2789_v54 }
 0x8af   :  { %2547 = vmatprep.subr.bf16.mxu1 %v2789_v54 }
 0x8b2   :  { %2549 = vmatpush3.bf16.msra.mxu1 %v2956_v58 }
 0x8b3   :  { %2550 = vmatprep.subr.bf16.mxu1 %v2789_v54 }
 0x8b6   :  { %2552 = vmatpush3.bf16.msra.mxu1 %v2969_v62 }
 0x8b7   :  { %2571 = vmatprep.subr.bf16.mxu1 %v2789_v54 }
 0x97b   :  { %v699_v49 = vpop.f32.mrb[2].mxu0 }
 0x97c   :  { %v700_v50 = vadd.f32 %v2997_v3, %v699_v49  ;;  %v2294_v52 = vpop.f32.mrb[3].mxu0  ;;  %v803_v56 = vpop.f32.mrb[8].mxu1 }
 0x97d   :  { %v808_v57 = vrot.slane %v803_v56, 4  ;;  %v2305_v59 = vpop.f32.mrb[9].mxu1 }
 0x97e   :  { %2682 = vtanh.f32 %v700_v50  ;;  %v2049_v0 = vmul.f32 -1.442695, %v700_v50 }
 0x97f   :  { %v810_v60 = vadd.f32 %v808_v57, %v2921_v34 }
 0x981   :  { %2684 = vtanh.f32 %v810_v60  ;;  %v2051_v1 = vmul.f32 -1.442695, %v810_v60 }
 0x982   :  { %2686 = vpow2.f32 %v2049_v0 }
 0x983   :  { %2688 = vpow2.f32 %v2051_v1 }
 0x988   :  { %v2683_v61 = vpop.eup %2682 }
 0x989   :  { %712 = vrot.lane.b32.xlu0 %v2683_v61, %s2792_s6 }
 0x98b   :  { %v2685_v63 = vpop.eup %2684 }
 0x98c   :  { %823 = vrot.lane.b32.xlu1 %v2685_v63, %s2792_s6  ;;  %v2687_v2 = vpop.eup %2686 }
 0x98d   :  { %v2689_v4 = vpop.eup %2688  ;;  %v706_v5 = vadd.f32 1.0, %v2687_v2 }
 0x98e   :  { %v814_v6 = vadd.f32 1.0, %v2689_v4 }
 0x98f   :  { %2690 = vrcp.f32 %v706_v5 }
 0x990   :  { %2692 = vrcp.f32 %v814_v6 }
 0x999   :  { %v2691_v7 = vpop.eup %2690 }
 0x99a   :  { %v2693_v10 = vpop.eup %2692  ;;  %v710_v13 = vmul.f32 %v2691_v7, %v3005_v28 }
 0x99b   :  { %v821_v17 = vmul.f32 %v2693_v10, %v819_v14 }
 0x9fb   :  { %v713_v8 = vpop.permute.xlu0 %712 }
 0x9fc   :  { %v715_v9 = vmul.f32 %v2691_v7, %v713_v8 }
 0x9fe   :  { %717 = vrot.lane.b32.xlu0 %v715_v9, %s2792_s6  ;;  %v824_v11 = vpop.permute.xlu1 %823 }
 0x9ff   :  { %v826_v12 = vmul.f32 %v2693_v10, %v824_v11 }
 0xa01   :  { %828 = vrot.lane.b32.xlu1 %v826_v12, %s2792_s6 }
 0xa70   :  { %v718_v15 = vpop.permute.xlu0 %717 }
 0xa71   :  { %v3047_v16 = vadd.f32 %v718_v15, %v710_v13 }
 0xa73   :  { %2694 = vtanh.f32 %v3047_v16  ;;  %v829_v18 = vpop.permute.xlu1 %828 }
 0xa74   :  { %v3050_v19 = vadd.f32 %v829_v18, %v821_v17 }
 0xa76   :  { %2696 = vtanh.f32 %v3050_v19  ;;  %v1037_v1 = vrot.slane %v3050_v19, 6 }
 0xa7d   :  { %v2695_v20 = vpop.eup %2694 }
 0xa7e   :  { %723 = vrot.lane.b32.xlu0 %v2695_v20, %s2792_s6 }
 0xa80   :  { %v2697_v21 = vpop.eup %2696 }
 0xa81   :  { %834 = vrot.lane.b32.xlu1 %v2697_v21, %s2792_s6 }
 0xaf0   :  { %v724_v22 = vpop.permute.xlu0 %723 }
 0xaf1   :  { %v3055_v23 = vmul.f32 %v2691_v7, %v724_v22 }
 0xaf3   :  { %v842_v25 = vrot.slane %v3055_v23, 4  ;;  %v835_v26 = vpop.permute.xlu1 %834 }
 0xaf4   :  { %v837_v27 = vmul.f32 %v2693_v10, %v835_v26 }
 0xaf5   :  { %843 = vrot.lane.b32.xlu1 %v842_v25, %s2788_s1 }
 0xaf6   :  { %839 = vrot.lane.b32.xlu0 %v837_v27, %s2787_s0  ;;  %v950_v28 = vrot.slane %v837_v27, 4 }
 0xafa   :  { %951 = vrot.lane.b32.xlu0 %v950_v28, %s2787_s0 }
 0xb67   :  { %v844_v30 = vpop.permute.xlu1 %843 }
 0xb68   :  { %v840_v31 = vpop.permute.xlu0 %839 }
 0xb69   :  { %v846_v33 = vsel %vm224_vm3, %v840_v31, %v844_v30 }
 0xb6a   :  { %v848_v35 = vrot.slane %v846_v33, 4 }
 0xb6c   :  { %v952_v36 = vpop.permute.xlu0 %951  ;;  %2323 = vmatmul.mubr.msk.f32.vlgmr.msra.gmra.mrb[10].mxu1 %vm413_vm4, %v848_v35 }
 0xb6d   :  { %2334 = vmatmul.mubr.msk.f32.vlgmr.msra.gmra.mrb[4].mxu0 %vm224_vm3, %v952_v36  ;;  %2573 = vmatpush3.bf16.msra.mxu1 %v2893_v24 }
 0xb6e   :  { %2561 = vmatpush3.bf16.msra.mxu0 %v2938_v51  ;;  %2574 = vmatprep.subr.bf16.mxu1 %v2789_v54 }
 0xb6f   :  { %2562 = vmatprep.subr.bf16.mxu0 %v2789_v54  ;;  %2352 = vmatprep.mubr.msk.f32.mxu0 %vm2790_vm2, %v2791_v55 }
 0xb70   :  { %2363 = vmatprep.mubr.msk.f32.mxu1 %vm2790_vm2, %v2791_v55 }
 0xb71   :  { %2576 = vmatpush3.bf16.msra.mxu1 %v2906_v29 }
 0xb72   :  { %2564 = vmatpush3.bf16.msra.mxu0 %v2944_v53  ;;  %2577 = vmatprep.subr.bf16.mxu1 %v2789_v54 }
 0xb73   :  { %2565 = vmatprep.subr.bf16.mxu0 %v2789_v54 }
 0xb76   :  { %2567 = vmatpush3.bf16.msra.mxu0 %v2956_v58 }
 0xb77   :  { %2568 = vmatprep.subr.bf16.mxu0 %v2789_v54 }
 0xb7a   :  { %2570 = vmatpush3.bf16.msra.mxu0 %v2969_v62 }
 0xb7b   :  { %2589 = vmatprep.subr.bf16.mxu0 %v2789_v54 }
 0xc3f   :  { %v917_v37 = vpop.f32.mrb[10].mxu1 }
 0xc40   :  { %v918_v38 = vadd.f32 %v2997_v3, %v917_v37  ;;  %v2324_v40 = vpop.f32.mrb[11].mxu1  ;;  %v1021_v41 = vpop.f32.mrb[4].mxu0 }
 0xc41   :  { %v1026_v42 = vrot.slane %v1021_v41, 2  ;;  %v2335_v43 = vpop.f32.mrb[5].mxu0 }
 0xc42   :  { %2698 = vtanh.f32 %v918_v38  ;;  %v2053_v47 = vmul.f32 -1.442695, %v918_v38 }
 0xc43   :  { %v1028_v44 = vadd.f32 %v1026_v42, %v2921_v34 }
 0xc45   :  { %2700 = vtanh.f32 %v1028_v44  ;;  %v2055_v48 = vmul.f32 -1.442695, %v1028_v44 }
 0xc46   :  { %2702 = vpow2.f32 %v2053_v47 }
 0xc47   :  { %2704 = vpow2.f32 %v2055_v48 }
 0xc4c   :  { %v2699_v45 = vpop.eup %2698 }
 0xc4d   :  { %930 = vrot.lane.b32.xlu1 %v2699_v45, %s2792_s6 }
 0xc4f   :  { %v2701_v46 = vpop.eup %2700 }
 0xc50   :  { %1041 = vrot.lane.b32.xlu0 %v2701_v46, %s2792_s6  ;;  %v2703_v49 = vpop.eup %2702 }
 0xc51   :  { %v2705_v50 = vpop.eup %2704  ;;  %v924_v52 = vadd.f32 1.0, %v2703_v49 }
 0xc52   :  { %v1032_v56 = vadd.f32 1.0, %v2705_v50 }
 0xc53   :  { %2706 = vrcp.f32 %v924_v52 }
 0xc54   :  { %2708 = vrcp.f32 %v1032_v56 }
 0xc5d   :  { %v2707_v57 = vpop.eup %2706 }
 0xc5e   :  { %v2709_v60 = vpop.eup %2708  ;;  %v928_v0 = vmul.f32 %v2707_v57, %v3047_v16 }
 0xc5f   :  { %v1039_v5 = vmul.f32 %v2709_v60, %v1037_v1 }
 0xcbf   :  { %v931_v59 = vpop.permute.xlu1 %930 }
 0xcc0   :  { %v933_v34 = vmul.f32 %v2707_v57, %v931_v59 }
 0xcc2   :  { %v1042_v61 = vpop.permute.xlu0 %1041  ;;  %935 = vrot.lane.b32.xlu1 %v933_v34, %s2792_s6 }
 0xcc3   :  { %v1044_v63 = vmul.f32 %v2709_v60, %v1042_v61 }
 0xcc5   :  { %1046 = vrot.lane.b32.xlu0 %v1044_v63, %s2792_s6 }
 0xd34   :  { %v936_v2 = vpop.permute.xlu1 %935 }
 0xd35   :  { %v3088_v4 = vadd.f32 %v936_v2, %v928_v0 }
 0xd37   :  { %2710 = vtanh.f32 %v3088_v4  ;;  %v1047_v6 = vpop.permute.xlu0 %1046 }
 0xd38   :  { %v3091_v7 = vadd.f32 %v1047_v6, %v1039_v5 }
 0xd3a   :  { %2712 = vtanh.f32 %v3091_v7  ;;  %v1252_v47 = vrot.slane %v3091_v7, 6 }
 0xd41   :  { %v2711_v8 = vpop.eup %2710 }
 0xd42   :  { %941 = vrot.lane.b32.xlu1 %v2711_v8, %s2792_s6 }
 0xd44   :  { %v2713_v9 = vpop.eup %2712 }
 0xd45   :  { %1052 = vrot.lane.b32.xlu0 %v2713_v9, %s2792_s6 }
 0xdb4   :  { %v942_v10 = vpop.permute.xlu1 %941 }
 0xdb5   :  { %v3096_v11 = vmul.f32 %v2707_v57, %v942_v10 }
 0xdb7   :  { %v1060_v12 = vrot.slane %v3096_v11, 2  ;;  %v1053_v13 = vpop.permute.xlu0 %1052 }
 0xdb8   :  { %v1055_v14 = vmul.f32 %v2709_v60, %v1053_v13 }
 0xdb9   :  { %1061 = vrot.lane.b32.xlu0 %v1060_v12, %s2788_s1 }
 0xdba   :  { %1057 = vrot.lane.b32.xlu1 %v1055_v14, %s2787_s0  ;;  %v1168_v15 = vrot.slane %v1055_v14, 6 }
 0xdbe   :  { %1169 = vrot.lane.b32.xlu1 %v1168_v15, %s2787_s0 }
 0xe2b   :  { %v1062_v16 = vpop.permute.xlu0 %1061 }
 0xe2c   :  { %v1058_v17 = vpop.permute.xlu1 %1057 }
 0xe2d   :  { %v1064_v18 = vsel %vm224_vm3, %v1058_v17, %v1062_v16 }
 0xe2e   :  { %v1066_v19 = vrot.slane %v1064_v18, 6 }
 0xe30   :  { %2353 = vmatmul.mubr.msk.f32.vlgmr.msra.gmra.mrb[6].mxu0 %vm413_vm4, %v1066_v19  ;;  %v1170_v20 = vpop.permute.xlu1 %1169 }
 0xe31   :  { %2364 = vmatmul.mubr.msk.f32.vlgmr.msra.gmra.mrb[12].mxu1 %vm224_vm3, %v1170_v20  ;;  %2591 = vmatpush3.bf16.msra.mxu0 %v2893_v24 }
 0xe32   :  { %2579 = vmatpush3.bf16.msra.mxu1 %v2938_v51  ;;  %2592 = vmatprep.subr.bf16.mxu0 %v2789_v54 }
 0xe33   :  { %2580 = vmatprep.subr.bf16.mxu1 %v2789_v54  ;;  %2393 = vmatprep.mubr.msk.f32.mxu0 %vm2790_vm2, %v2791_v55 }
 0xe34   :  { %2382 = vmatprep.mubr.msk.f32.mxu1 %vm2790_vm2, %v2791_v55 }
 0xe35   :  { %2594 = vmatpush3.bf16.msra.mxu0 %v2906_v29 }
 0xe36   :  { %2582 = vmatpush3.bf16.msra.mxu1 %v2944_v53  ;;  %2595 = vmatprep.subr.bf16.mxu0 %v2789_v54 }
 0xe37   :  { %2583 = vmatprep.subr.bf16.mxu1 %v2789_v54 }
 0xe3a   :  { %2585 = vmatpush3.bf16.msra.mxu1 %v2956_v58 }
 0xe3b   :  { %2586 = vmatprep.subr.bf16.mxu1 %v2789_v54 }
 0xe3e   :  { %2588 = vmatpush3.bf16.msra.mxu1 %v2969_v62 }
 0xe3f   :  { %2607 = vmatprep.subr.bf16.mxu1 %v2789_v54 }
 0xf03   :  { %v1135_v21 = vpop.f32.mrb[6].mxu0 }
 0xf04   :  { %v1136_v22 = vadd.f32 %v2997_v3, %v1135_v21  ;;  %v2354_v25 = vpop.f32.mrb[7].mxu0  ;;  %v1239_v26 = vpop.f32.mrb[12].mxu1 }
 0xf05   :  { %v1243_v27 = vadd.f32 %v1239_v26, %v2919_v32  ;;  %v2365_v28 = vpop.f32.mrb[13].mxu1 }
 0xf06   :  { %2714 = vtanh.f32 %v1136_v22  ;;  %v2057_v33 = vmul.f32 -1.442695, %v1136_v22 }
 0xf07   :  { %2716 = vtanh.f32 %v1243_v27  ;;  %v2059_v35 = vmul.f32 -1.442695, %v1243_v27 }
 0xf08   :  { %2718 = vpow2.f32 %v2057_v33 }
 0xf09   :  { %2720 = vpow2.f32 %v2059_v35 }
 0xf10   :  { %v2715_v30 = vpop.eup %2714 }
 0xf11   :  { %v2717_v31 = vpop.eup %2716  ;;  %1148 = vrot.lane.b32.xlu0 %v2715_v30, %s2792_s6 }
 0xf12   :  { %1256 = vrot.lane.b32.xlu1 %v2717_v31, %s2792_s6  ;;  %v2719_v36 = vpop.eup %2718 }
 0xf13   :  { %v2721_v37 = vpop.eup %2720  ;;  %v1142_v38 = vadd.f32 1.0, %v2719_v36 }
 0xf14   :  { %v1247_v40 = vadd.f32 1.0, %v2721_v37 }
 0xf15   :  { %2722 = vrcp.f32 %v1142_v38 }
 0xf16   :  { %2724 = vrcp.f32 %v1247_v40 }
 0xf1f   :  { %v2723_v41 = vpop.eup %2722 }
 0xf20   :  { %v2725_v43 = vpop.eup %2724  ;;  %v1146_v48 = vmul.f32 %v2723_v41, %v3088_v4 }
 0xf21   :  { %v1254_v50 = vmul.f32 %v2725_v43, %v1252_v47 }
 0xf83   :  { %v1149_v42 = vpop.permute.xlu0 %1148 }
 0xf84   :  { %v1151_v44 = vmul.f32 %v2723_v41, %v1149_v42  ;;  %v1257_v45 = vpop.permute.xlu1 %1256 }
 0xf85   :  { %v1259_v46 = vmul.f32 %v2725_v43, %v1257_v45 }
 0xf86   :  { %1153 = vrot.lane.b32.xlu0 %v1151_v44, %s2792_s6 }
 0xf87   :  { %1261 = vrot.lane.b32.xlu1 %v1259_v46, %s2792_s6 }
 0xff8   :  { %v1154_v49 = vpop.permute.xlu0 %1153 }
 0xff9   :  { %v3129_v52 = vadd.f32 %v1154_v49, %v1146_v48  ;;  %v1262_v56 = vpop.permute.xlu1 %1261 }
 0xffa   :  { %v3131_v57 = vadd.f32 %v1262_v56, %v1254_v50 }
 0xffb   :  { %2726 = vtanh.f32 %v3129_v52 }
 0xffc   :  { %2728 = vtanh.f32 %v3131_v57  ;;  %v1465_v30 = vrot.slane %v3131_v57, 6 }
0x1005   :  { %v2727_v59 = vpop.eup %2726 }
0x1006   :  { %v2729_v34 = vpop.eup %2728  ;;  %1159 = vrot.lane.b32.xlu0 %v2727_v59, %s2792_s6 }
0x1007   :  { %1267 = vrot.lane.b32.xlu1 %v2729_v34, %s2792_s6 }
0x1078   :  { %v1160_v60 = vpop.permute.xlu0 %1159 }
0x1079   :  { %v3137_v61 = vmul.f32 %v2723_v41, %v1160_v60  ;;  %v1268_v63 = vpop.permute.xlu1 %1267 }
0x107a   :  { %v1270_v0 = vmul.f32 %v2725_v43, %v1268_v63 }
0x107b   :  { %1275 = vrot.lane.b32.xlu1 %v3137_v61, %s2788_s1 }
0x107c   :  { %1272 = vrot.lane.b32.xlu0 %v1270_v0, %s2787_s0 }
0x10ed   :  { %v1276_v1 = vpop.permute.xlu1 %1275 }
0x10ee   :  { %v1273_v2 = vpop.permute.xlu0 %1272 }
0x10ef   :  { %v1278_v4 = vsel %vm224_vm3, %v1273_v2, %v1276_v1  ;;  %2394 = vmatmul.mubr.msk.f32.vlgmr.msra.gmra.mrb[8].mxu0 %vm224_vm3, %v1273_v2 }
0x10f0   :  { %2383 = vmatmul.mubr.msk.f32.vlgmr.msra.gmra.mrb[14].mxu1 %vm413_vm4, %v1278_v4  ;;  %2597 = vmatpush3.bf16.msra.mxu0 %v2938_v51 }
0x10f1   :  { %2598 = vmatprep.subr.bf16.mxu0 %v2789_v54  ;;  %2609 = vmatpush3.bf16.msra.mxu1 %v2893_v24 }
0x10f2   :  { %2610 = vmatprep.subr.bf16.mxu1 %v2789_v54  ;;  %2412 = vmatprep.mubr.msk.f32.mxu0 %vm2790_vm2, %v2791_v55 }
0x10f3   :  { %2423 = vmatprep.mubr.msk.f32.mxu1 %vm2790_vm2, %v2791_v55 }
0x10f4   :  { %2600 = vmatpush3.bf16.msra.mxu0 %v2944_v53 }
0x10f5   :  { %2601 = vmatprep.subr.bf16.mxu0 %v2789_v54  ;;  %2612 = vmatpush3.bf16.msra.mxu1 %v2906_v29 }
0x10f6   :  { %2613 = vmatprep.subr.bf16.mxu1 %v2789_v54 }
0x10f8   :  { %2603 = vmatpush3.bf16.msra.mxu0 %v2956_v58 }
0x10f9   :  { %2604 = vmatprep.subr.bf16.mxu0 %v2789_v54 }
0x10fc   :  { %2606 = vmatpush3.bf16.msra.mxu0 %v2969_v62 }
0x10fd   :  { %2625 = vmatprep.subr.bf16.mxu0 %v2789_v54 }
0x11c2   :  { %v1449_v5 = vpop.f32.mrb[8].mxu0 }
0x11c3   :  { %v1454_v6 = vrot.slane %v1449_v5, 6  ;;  %v1348_v7 = vpop.f32.mrb[14].mxu1  ;;  %v2395_v8 = vpop.f32.mrb[9].mxu0 }
0x11c4   :  { %v1349_v9 = vadd.f32 %v2997_v3, %v1348_v7  ;;  %v2384_v10 = vpop.f32.mrb[15].mxu1 }
0x11c5   :  { %v1456_v12 = vadd.f32 %v1454_v6, %v2919_v32 }
0x11c6   :  { %2730 = vtanh.f32 %v1349_v9  ;;  %v2061_v15 = vmul.f32 -1.442695, %v1349_v9 }
0x11c7   :  { %2732 = vtanh.f32 %v1456_v12  ;;  %v2063_v16 = vmul.f32 -1.442695, %v1456_v12 }
0x11c8   :  { %2734 = vpow2.f32 %v2061_v15 }
0x11c9   :  { %2736 = vpow2.f32 %v2063_v16 }
0x11d0   :  { %v2731_v13 = vpop.eup %2730 }
0x11d1   :  { %v2733_v14 = vpop.eup %2732  ;;  %1361 = vrot.lane.b32.xlu0 %v2731_v13, %s2792_s6 }
0x11d2   :  { %1469 = vrot.lane.b32.xlu1 %v2733_v14, %s2792_s6  ;;  %v2735_v17 = vpop.eup %2734 }
0x11d3   :  { %v2737_v18 = vpop.eup %2736  ;;  %v1355_v19 = vadd.f32 1.0, %v2735_v17 }
0x11d4   :  { %v1460_v20 = vadd.f32 1.0, %v2737_v18 }
0x11d5   :  { %2738 = vrcp.f32 %v1355_v19 }
0x11d6   :  { %2740 = vrcp.f32 %v1460_v20 }
0x11df   :  { %v2739_v21 = vpop.eup %2738 }
0x11e0   :  { %v2741_v25 = vpop.eup %2740  ;;  %v1359_v31 = vmul.f32 %v2739_v21, %v3129_v52 }
0x11e1   :  { %v1467_v35 = vmul.f32 %v2741_v25, %v1465_v30 }
0x1243   :  { %v1362_v22 = vpop.permute.xlu0 %1361 }
0x1244   :  { %v1364_v26 = vmul.f32 %v2739_v21, %v1362_v22  ;;  %v1470_v27 = vpop.permute.xlu1 %1469 }
0x1245   :  { %v1472_v28 = vmul.f32 %v2741_v25, %v1470_v27 }
0x1246   :  { %1366 = vrot.lane.b32.xlu0 %v1364_v26, %s2792_s6 }
0x1247   :  { %1474 = vrot.lane.b32.xlu1 %v1472_v28, %s2792_s6 }
0x12b8   :  { %v1367_v33 = vpop.permute.xlu0 %1366 }
0x12b9   :  { %v3169_v36 = vadd.f32 %v1367_v33, %v1359_v31  ;;  %v1475_v37 = vpop.permute.xlu1 %1474 }
0x12ba   :  { %v3171_v38 = vadd.f32 %v1475_v37, %v1467_v35 }
0x12bb   :  { %2742 = vtanh.f32 %v3169_v36 }
0x12bc   :  { %2744 = vtanh.f32 %v3171_v38  ;;  %v1683_v17 = vrot.slane %v3171_v38, 6 }
0x12c5   :  { %v2743_v40 = vpop.eup %2742 }
0x12c6   :  { %v2745_v41 = vpop.eup %2744  ;;  %1372 = vrot.lane.b32.xlu0 %v2743_v40, %s2792_s6 }
0x12c7   :  { %1480 = vrot.lane.b32.xlu1 %v2745_v41, %s2792_s6 }
0x1338   :  { %v1373_v42 = vpop.permute.xlu0 %1372 }
0x1339   :  { %v3177_v43 = vmul.f32 %v2739_v21, %v1373_v42  ;;  %v1481_v44 = vpop.permute.xlu1 %1480 }
0x133a   :  { %v1483_v45 = vmul.f32 %v2741_v25, %v1481_v44 }
0x133b   :  { %v1488_v46 = vrot.slane %v3177_v43, 6 }
0x133c   :  { %1485 = vrot.lane.b32.xlu0 %v1483_v45, %s2787_s0  ;;  %v1596_v47 = vrot.slane %v1483_v45, 2 }
0x133d   :  { %1489 = vrot.lane.b32.xlu1 %v1488_v46, %s2788_s1 }
0x1340   :  { %1597 = vrot.lane.b32.xlu0 %v1596_v47, %s2787_s0 }
0x13ae   :  { %v1486_v48 = vpop.permute.xlu0 %1485 }
0x13af   :  { %v1490_v49 = vpop.permute.xlu1 %1489 }
0x13b0   :  { %v1492_v50 = vsel %vm224_vm3, %v1486_v48, %v1490_v49 }
0x13b1   :  { %v1494_v52 = vrot.slane %v1492_v50, 2 }
0x13b2   :  { %v1598_v56 = vpop.permute.xlu0 %1597 }
0x13b3   :  { %2413 = vmatmul.mubr.msk.f32.vlgmr.msra.gmra.mrb[10].mxu0 %vm413_vm4, %v1494_v52  ;;  %2424 = vmatmul.mubr.msk.f32.vlgmr.msra.gmra.mrb[16].mxu1 %vm224_vm3, %v1598_v56 }
0x13b4   :  { %2615 = vmatpush3.bf16.msra.mxu1 %v2938_v51  ;;  %2627 = vmatpush3.bf16.msra.mxu0 %v2893_v24 }
0x13b5   :  { %2616 = vmatprep.subr.bf16.mxu1 %v2789_v54  ;;  %2628 = vmatprep.subr.bf16.mxu0 %v2789_v54 }
0x13b6   :  { %2442 = vmatprep.mubr.msk.f32.mxu1 %vm2790_vm2, %v2791_v55  ;;  %2453 = vmatprep.mubr.msk.f32.mxu0 %vm2790_vm2, %v2791_v55 }
0x13b8   :  { %2618 = vmatpush3.bf16.msra.mxu1 %v2944_v53  ;;  %2630 = vmatpush3.bf16.msra.mxu0 %v2906_v29 }
0x13b9   :  { %2619 = vmatprep.subr.bf16.mxu1 %v2789_v54  ;;  %2631 = vmatprep.subr.bf16.mxu0 %v2789_v54 }
0x13bc   :  { %2621 = vmatpush3.bf16.msra.mxu1 %v2956_v58 }
0x13bd   :  { %2622 = vmatprep.subr.bf16.mxu1 %v2789_v54 }
0x13c0   :  { %2624 = vmatpush3.bf16.msra.mxu1 %v2969_v62 }
0x1486   :  { %v1563_v24 = vpop.f32.mrb[10].mxu0  ;;  %v1667_v57 = vpop.f32.mrb[16].mxu1 }
0x1487   :  { %v1564_v59 = vadd.f32 %v2997_v3, %v1563_v24  ;;  %v1672_v34 = vrot.slane %v1667_v57, 4  ;;  %v2414_v60 = vpop.f32.mrb[11].mxu0  ;;  %v2425_v63 = vpop.f32.mrb[17].mxu1 }
0x1489   :  { %2746 = vtanh.f32 %v1564_v59  ;;  %v1674_v29 = vadd.f32 %v1672_v34, %v2919_v32  ;;  %v2065_v2 = vmul.f32 -1.442695, %v1564_v59 }
0x148b   :  { %2748 = vtanh.f32 %v1674_v29  ;;  %v2067_v4 = vmul.f32 -1.442695, %v1674_v29 }
0x148c   :  { %2750 = vpow2.f32 %v2065_v2 }
0x148d   :  { %2752 = vpow2.f32 %v2067_v4 }
0x1493   :  { %v2747_v0 = vpop.eup %2746 }
0x1494   :  { %1576 = vrot.lane.b32.xlu1 %v2747_v0, %s2792_s6 }
0x1495   :  { %v2749_v1 = vpop.eup %2748 }
0x1496   :  { %1687 = vrot.lane.b32.xlu0 %v2749_v1, %s2792_s6  ;;  %v2751_v5 = vpop.eup %2750 }
0x1497   :  { %v2753_v6 = vpop.eup %2752  ;;  %v1570_v7 = vadd.f32 1.0, %v2751_v5 }
0x1498   :  { %v1678_v8 = vadd.f32 1.0, %v2753_v6 }
0x1499   :  { %2754 = vrcp.f32 %v1570_v7 }
0x149a   :  { %2756 = vrcp.f32 %v1678_v8 }
0x14a3   :  { %v2755_v9 = vpop.eup %2754 }
0x14a4   :  { %v2757_v13 = vpop.eup %2756  ;;  %v1574_v16 = vmul.f32 %v2755_v9, %v3169_v36 }
0x14a5   :  { %v1685_v20 = vmul.f32 %v2757_v13, %v1683_v17 }
0x1506   :  { %v1577_v10 = vpop.permute.xlu1 %1576 }
0x1507   :  { %v1579_v12 = vmul.f32 %v2755_v9, %v1577_v10 }
0x1508   :  { %v1688_v14 = vpop.permute.xlu0 %1687 }
0x1509   :  { %1581 = vrot.lane.b32.xlu1 %v1579_v12, %s2792_s6  ;;  %v1690_v15 = vmul.f32 %v2757_v13, %v1688_v14 }
0x150b   :  { %1692 = vrot.lane.b32.xlu0 %v1690_v15, %s2792_s6 }
0x157b   :  { %v1582_v18 = vpop.permute.xlu1 %1581 }
0x157c   :  { %v3209_v19 = vadd.f32 %v1582_v18, %v1574_v16 }
0x157d   :  { %v1693_v21 = vpop.permute.xlu0 %1692 }
0x157e   :  { %2758 = vtanh.f32 %v3209_v19  ;;  %v3212_v22 = vadd.f32 %v1693_v21, %v1685_v20 }
0x1580   :  { %2760 = vtanh.f32 %v3212_v22  ;;  %v1901_v63 = vrot.slane %v3212_v22, 6 }
0x1588   :  { %v2759_v25 = vpop.eup %2758 }
0x1589   :  { %1587 = vrot.lane.b32.xlu1 %v2759_v25, %s2792_s6 }
0x158a   :  { %v2761_v26 = vpop.eup %2760 }
0x158b   :  { %1698 = vrot.lane.b32.xlu0 %v2761_v26, %s2792_s6 }
0x15fb   :  { %v1588_v27 = vpop.permute.xlu1 %1587 }
0x15fc   :  { %v3217_v28 = vmul.f32 %v2755_v9, %v1588_v27 }
0x15fd   :  { %v1699_v31 = vpop.permute.xlu0 %1698 }
0x15fe   :  { %v1706_v30 = vrot.slane %v3217_v28, 4  ;;  %v1701_v33 = vmul.f32 %v2757_v13, %v1699_v31 }
0x1600   :  { %1707 = vrot.lane.b32.xlu0 %v1706_v30, %s2788_s1  ;;  %1703 = vrot.lane.b32.xlu1 %v1701_v33, %s2787_s0  ;;  %v1814_v35 = vrot.slane %v1701_v33, 4 }
0x1604   :  { %1815 = vrot.lane.b32.xlu1 %v1814_v35, %s2787_s0 }
0x1672   :  { %v1708_v36 = vpop.permute.xlu0 %1707  ;;  %v1704_v37 = vpop.permute.xlu1 %1703 }
0x1673   :  { %v1710_v38 = vsel %vm224_vm3, %v1704_v37, %v1708_v36 }
0x1674   :  { %v1712_v40 = vrot.slane %v1710_v38, 4 }
0x1676   :  { %v1816_v41 = vpop.permute.xlu1 %1815  ;;  %2443 = vmatmul.mubr.msk.f32.vlgmr.msra.gmra.mrb[18].mxu1 %vm413_vm4, %v1712_v40 }
0x1677   :  { %2454 = vmatmul.mubr.msk.f32.vlgmr.msra.gmra.mrb[12].mxu0 %vm224_vm3, %v1816_v41 }
0x1678   :  { %2633 = vmatpush3.bf16.msra.mxu0 %v2938_v51  ;;  %2472 = vmatprep.mubr.msk.f32.mxu0 %vm2790_vm2, %v2791_v55 }
0x1679   :  { %2634 = vmatprep.subr.bf16.mxu0 %v2789_v54 }
0x167c   :  { %2636 = vmatpush3.bf16.msra.mxu0 %v2944_v53 }
0x167d   :  { %2637 = vmatprep.subr.bf16.mxu0 %v2789_v54 }
0x1680   :  { %2639 = vmatpush3.bf16.msra.mxu0 %v2956_v58 }
0x1681   :  { %2640 = vmatprep.subr.bf16.mxu0 %v2789_v54 }
0x1684   :  { %2642 = vmatpush3.bf16.msra.mxu0 %v2969_v62 }
0x1749   :  { %v1781_v42 = vpop.f32.mrb[18].mxu1 }
0x174a   :  { %v1782_v44 = vadd.f32 %v2997_v3, %v1781_v42  ;;  %v2444_v45 = vpop.f32.mrb[19].mxu1  ;;  %v1885_v51 = vpop.f32.mrb[12].mxu0 }
0x174b   :  { %v1890_v46 = vrot.slane %v1885_v51, 2  ;;  %v2455_v47 = vpop.f32.mrb[13].mxu0 }
0x174c   :  { %2762 = vtanh.f32 %v1782_v44  ;;  %v2069_v54 = vmul.f32 -1.442695, %v1782_v44 }
0x174d   :  { %v1892_v55 = vadd.f32 %v1890_v46, %v2919_v32 }
0x174f   :  { %2764 = vtanh.f32 %v1892_v55  ;;  %v2071_v58 = vmul.f32 -1.442695, %v1892_v55 }
0x1750   :  { %2766 = vpow2.f32 %v2069_v54 }
0x1751   :  { %2768 = vpow2.f32 %v2071_v58 }
0x1756   :  { %v2763_v53 = vpop.eup %2762 }
0x1757   :  { %1794 = vrot.lane.b32.xlu0 %v2763_v53, %s2792_s6 }
0x1759   :  { %v2765_v48 = vpop.eup %2764 }
0x175a   :  { %1905 = vrot.lane.b32.xlu1 %v2765_v48, %s2792_s6  ;;  %v2767_v62 = vpop.eup %2766 }
0x175b   :  { %v2769_v49 = vpop.eup %2768  ;;  %v1788_v50 = vadd.f32 1.0, %v2767_v62 }
0x175c   :  { %v1896_v52 = vadd.f32 1.0, %v2769_v49 }
0x175d   :  { %2770 = vrcp.f32 %v1788_v50 }
0x175e   :  { %2772 = vrcp.f32 %v1896_v52 }
0x1767   :  { %v2771_v56 = vpop.eup %2770 }
0x1768   :  { %v2773_v57 = vpop.eup %2772  ;;  %v1792_v60 = vmul.f32 %v2771_v56, %v3209_v19 }
0x1769   :  { %v1903_v1 = vmul.f32 %v2773_v57, %v1901_v63 }
0x17c9   :  { %v1795_v24 = vpop.permute.xlu0 %1794 }
0x17ca   :  { %v1797_v32 = vmul.f32 %v2771_v56, %v1795_v24 }
0x17cc   :  { %v1906_v59 = vpop.permute.xlu1 %1905  ;;  %1799 = vrot.lane.b32.xlu0 %v1797_v32, %s2792_s6 }
0x17cd   :  { %v1908_v34 = vmul.f32 %v2773_v57, %v1906_v59 }
0x17cf   :  { %1910 = vrot.lane.b32.xlu1 %v1908_v34, %s2792_s6 }
0x183e   :  { %v1800_v29 = vpop.permute.xlu0 %1799 }
0x183f   :  { %v1802_v0 = vadd.f32 %v1800_v29, %v1792_v60 }
0x1841   :  { %2774 = vtanh.f32 %v1802_v0  ;;  %v1911_v2 = vpop.permute.xlu1 %1910 }
0x1842   :  { %v1913_v4 = vadd.f32 %v1911_v2, %v1903_v1 }
0x1844   :  { %2776 = vtanh.f32 %v1913_v4 }
0x184b   :  { %v2775_v5 = vpop.eup %2774 }
0x184c   :  { %1805 = vrot.lane.b32.xlu0 %v2775_v5, %s2792_s6 }
0x184e   :  { %v2777_v6 = vpop.eup %2776 }
0x184f   :  { %1916 = vrot.lane.b32.xlu1 %v2777_v6, %s2792_s6 }
0x18be   :  { %v1806_v7 = vpop.permute.xlu0 %1805 }
0x18bf   :  { %v1808_v8 = vmul.f32 %v2771_v56, %v1806_v7 }
0x18c1   :  { %v1924_v9 = vrot.slane %v1808_v8, 2  ;;  %v1917_v10 = vpop.permute.xlu1 %1916 }
0x18c2   :  { %v1919_v12 = vmul.f32 %v2773_v57, %v1917_v10 }
0x18c3   :  { %1925 = vrot.lane.b32.xlu1 %v1924_v9, %s2788_s1 }
0x18c4   :  { %1921 = vrot.lane.b32.xlu0 %v1919_v12, %s2787_s0 }
0x1935   :  { %v1926_v13 = vpop.permute.xlu1 %1925 }
0x1936   :  { %v1922_v14 = vpop.permute.xlu0 %1921 }
0x1937   :  { %v1928_v15 = vsel %vm224_vm3, %v1922_v14, %v1926_v13 }
0x1938   :  { %v1930_v16 = vrot.slane %v1928_v15, 6 }
0x193a   :  { %2473 = vmatmul.mubr.msk.f32.vlgmr.msra.gmra.mrb[14].mxu0 %vm413_vm4, %v1930_v16 }
0x1a0d   :  { %v1999_v17 = vpop.f32.mrb[14].mxu0 }
0x1a0e   :  { %v2000_v18 = vadd.f32 %v2997_v3, %v1999_v17  ;;  %v2474_v19 = vpop.f32.mrb[15].mxu0 }
0x1a10   :  { %2778 = vtanh.f32 %v2000_v18  ;;  %v2073_v21 = vmul.f32 -1.442695, %v2000_v18 }
0x1a12   :  { %2780 = vpow2.f32 %v2073_v21 }
0x1a1a   :  { %v2779_v20 = vpop.eup %2778 }
0x1a1b   :  { %2012 = vrot.lane.b32.xlu0 %v2779_v20, %s2792_s6 }
0x1a1c   :  { %v2781_v22 = vpop.eup %2780 }
0x1a1d   :  { %v2006_v25 = vadd.f32 1.0, %v2781_v22 }
0x1a1f   :  { %2782 = vrcp.f32 %v2006_v25 }
0x1a29   :  { %v2783_v26 = vpop.eup %2782 }
0x1a2a   :  { %v2010_v3 = vmul.f32 %v2783_v26, %v1802_v0 }
0x1a8d   :  { %v2013_v27 = vpop.permute.xlu0 %2012 }
0x1a8e   :  { %v2015_v30 = vmul.f32 %v2783_v26, %v2013_v27 }
0x1a90   :  { %2017 = vrot.lane.b32.xlu1 %v2015_v30, %s2792_s6 }
0x1a94   :  { %512 = vrot.lane.b32.xlu1 %v3014_v39, %s2787_s0 }
0x1a98   :  { %946 = vrot.lane.b32.xlu1 %v3096_v11, %s2787_s0 }
0x1a9c   :  { %1377 = vrot.lane.b32.xlu1 %v3177_v43, %s2787_s0 }
0x1aa0   :  { %1810 = vrot.lane.b32.xlu1 %v1808_v8, %s2787_s0 }
0x1b02   :  { %v2018_v31 = vpop.permute.xlu1 %2017 }
0x1b03   :  { %v2020_v33 = vadd.f32 %v2018_v31, %v2010_v3 }
0x1b05   :  { %2784 = vtanh.f32 %v2020_v33 }
0x1b06   :  { %v513_v35 = vpop.permute.xlu1 %512 }
0x1b07   :  { %516 = vst.msk [vmem:[%s3303_s4] sm:$0x3] %vm515_vm5, %v513_v35 }
0x1b0a   :  { %v947_v39 = vpop.permute.xlu1 %946 }
0x1b0b   :  { %949 = vst.msk [vmem:[%s3303_s4 + $0x4] sm:$0x3] %vm515_vm5, %v947_v39 }
0x1b0e   :  { %v1378_v11 = vpop.permute.xlu1 %1377 }
0x1b0f   :  { %v2785_v43 = vpop.eup %2784  ;;  %1380 = vst.msk [vmem:[%s3303_s4 + $0x8] sm:$0x3] %vm515_vm5, %v1378_v11 }
0x1b10   :  { %2023 = vrot.lane.b32.xlu0 %v2785_v43, %s2792_s6 }
0x1b12   :  { %v1811_v36 = vpop.permute.xlu1 %1810 }
0x1b13   :  { %1813 = vst.msk [vmem:[%s3303_s4 + $0xc] sm:$0x3] %vm515_vm5, %v1811_v36 }
0x1b14   :  { %728 = vrot.lane.b32.xlu0 %v3055_v23, %s2787_s0 }
0x1b18   :  { %1164 = vrot.lane.b32.xlu0 %v3137_v61, %s2787_s0 }
0x1b1c   :  { %1592 = vrot.lane.b32.xlu0 %v3217_v28, %s2787_s0 }
0x1b82   :  { %v2024_v37 = vpop.permute.xlu0 %2023 }
0x1b83   :  { %v2026_v38 = vmul.f32 %v2783_v26, %v2024_v37 }
0x1b85   :  { %2028 = vrot.lane.b32.xlu0 %v2026_v38, %s2787_s0 }
0x1b86   :  { %v729_v40 = vpop.permute.xlu0 %728 }
0x1b87   :  { %731 = vst.msk [vmem:[%s3303_s4 + $0x2] sm:$0x3] %vm515_vm5, %v729_v40 }
0x1b8a   :  { %v1165_v41 = vpop.permute.xlu0 %1164 }
0x1b8b   :  { %1167 = vst.msk [vmem:[%s3303_s4 + $0x6] sm:$0x3] %vm515_vm5, %v1165_v41 }
0x1b8e   :  { %v1593_v23 = vpop.permute.xlu0 %1592 }
0x1b8f   :  { %1595 = vst.msk [vmem:[%s3303_s4 + $0xa] sm:$0x3] %vm515_vm5, %v1593_v23 }
0x1bf7   :  { %v2029_v61 = vpop.permute.xlu0 %2028 }
0x1bf8   :  { %2031 = vst.msk [vmem:[%s3303_s4 + $0xe] sm:$0x3] %vm515_vm5, %v2029_v61 }

</bundles_post_ra>
